<compile_context>
chip_gen: v7x
topology: tpu7x:2x2x1
jax: 0.10.0
libtpu: 0.0.40
codegen_flags: <defaults>
</compile_context>

<pallas_src>
import numpy as np
import jax
import jax.numpy as jnp
from jax.experimental import pallas as pl
from jax.experimental.pallas import tpu as pltpu


# ------------------------------ tiling helpers ---------------------------------

_DEFAULT_ROW_TILE = 1024   # rows per grid step (amortizes ~0.35us per-step overhead)
_ROW_ALIGN = 16            # bf16-safe sublane granularity


def _round_up(n, m):
    return ((n + m - 1) // m) * m


def _tile_and_pad(n_rows):
    """Pick a row tile (multiple of 16) and padded row count.

    Keeps at least 2 grid steps when there is enough work so v7x can shard rows
    across its 2 TensorCores; irrelevant (and harmless) on v5e/v6e.
    """
    n = max(int(n_rows), 1)
    padded = _round_up(n, _ROW_ALIGN)
    tile = min(_DEFAULT_ROW_TILE, padded)
    if padded >= 2 * _ROW_ALIGN:
        tile = min(tile, _round_up((padded + 1) // 2, _ROW_ALIGN))
    padded = _round_up(padded, tile)
    return tile, padded


def _pack_width(*widths):
    return max(128, _round_up(sum(widths), 128))


def _cost_estimate(row_inputs, residents, out_specs_wd, padded):
    flops = 0
    for w in residents:
        if w.ndim == 2 and w.shape[0] > 1:          # matmul weights (biases are [1, D])
            flops += 2 * padded * w.shape[0] * w.shape[1]
    bytes_accessed = sum(int(np.prod(x.shape)) * x.dtype.itemsize for x in row_inputs)
    bytes_accessed += sum(int(np.prod(w.shape)) * w.dtype.itemsize for w in residents)
    bytes_accessed += sum(padded * d * jnp.dtype(dt).itemsize for d, dt in out_specs_wd)
    trans = padded * sum(d for d, _ in out_specs_wd)   # swish ~1 transcendental / elem
    return pl.CostEstimate(flops=int(flops), transcendentals=int(trans),
                           bytes_accessed=int(bytes_accessed))


def _run_rowwise(kernel, row_inputs, residents, out_specs_wd, tile):
    """Run a fused kernel on a row-tiled grid.

    row_inputs   : pre-padded [rows, d] arrays (rows % tile == 0), tiled along rows.
    residents    : 2-D weight (bf16) / bias (f32, [1,D]) arrays, fully VMEM-resident.
    out_specs_wd : list of (width, dtype); outputs come back padded.
    """
    padded = row_inputs[0].shape[0]
    assert padded % tile == 0
    grid = (padded // tile,)

    in_specs = ([pl.BlockSpec((tile, x.shape[1]), lambda i: (i, 0)) for x in row_inputs]
                + [pl.BlockSpec(w.shape, lambda i: (0, 0)) for w in residents])
    out_specs = tuple(pl.BlockSpec((tile, d), lambda i: (i, 0)) for d, _ in out_specs_wd)
    out_shape = tuple(jax.ShapeDtypeStruct((padded, d), dt) for d, dt in out_specs_wd)
    single = len(out_specs_wd) == 1

    return pl.pallas_call(
        kernel,
        grid=grid,
        in_specs=in_specs,
        out_specs=out_specs[0] if single else out_specs,
        out_shape=out_shape[0] if single else out_shape,
        compiler_params=pltpu.CompilerParams(dimension_semantics=("parallel",)),
        cost_estimate=_cost_estimate(row_inputs, residents, out_specs_wd, padded),
    )(*row_inputs, *residents)


# ------------------------------ kernel bodies ----------------------------------

def _swish(y):
    return y * jax.nn.sigmoid(y)


def _mm(x, w_ref):
    # bf16 MXU matmul, f32 accumulate (cast happens in-vreg, no extra HBM pass)
    return jnp.dot(x.astype(jnp.bfloat16), w_ref[...], preferred_element_type=jnp.float32)


def _pack_store(o_ref, parts, pack_w):
    # lane-dense packed store: [part0 | part1 | zeros] -> 128-lane-multiple buffer
    rows = parts[0].shape[0]
    used = sum(p.shape[1] for p in parts)
    if pack_w > used:
        parts = list(parts) + [jnp.zeros((rows, pack_w - used), jnp.float32)]
    o_ref[...] = jnp.concatenate(parts, axis=1).astype(o_ref.dtype)


def _make_emb_kernel(H, pack_w):
    # swish(lin_rbf(rbf)); swish(lin([h_i|h_j|rbf_h])) with the packed [3H,H] weight
    # (single K=3H matmul); output-block-0 edge term lin_rbf0(rbf)*x fused in.
    def kern(hi_ref, hj_ref, rbf_ref, w_rbf, b_rbf, w_cat, b_lin, w_rbf_o, o_ref):
        rbf = rbf_ref[...]
        rbf_h = _swish(_mm(rbf, w_rbf) + b_rbf[...])
        cat = jnp.concatenate([hi_ref[...], hj_ref[...], rbf_h.astype(jnp.bfloat16)],
                              axis=1)
        x = _swish(jnp.dot(cat, w_cat[...], preferred_element_type=jnp.float32)
                   + b_lin[...])
        g = _mm(rbf, w_rbf_o) * x
        _pack_store(o_ref, [x, g], pack_w)
    return kern


def _make_int_edge_kernel(H, I, pack_w):
    # packed lin_ji|lin_kj + swish, fused lin_rbf1@lin_rbf2, multiply, lin_down+swish.
    def kern(xp_ref, rbf_ref, w_jikj, b_jikj, w_rbf12, w_down, o_ref):
        x = xp_ref[...][:, :H]                               # bf16 slice of packed input
        jk = _swish(jnp.dot(x, w_jikj[...], preferred_element_type=jnp.float32)
                    + b_jikj[...])
        rbf_h = _mm(rbf_ref[...], w_rbf12)                   # fused basis chain
        x_kj = jk[:, H:] * rbf_h
        x_kj_dn = _swish(_mm(x_kj, w_down))
        _pack_store(o_ref, [jk[:, :H], x_kj_dn], pack_w)
    return kern


def _sbf_mul_kernel(xg_ref, sbf_ref, w_sbf12, o_ref):
    # fused (sbf @ W_sbf1 @ W_sbf2), multiplied with gathered x_kj; f32 summand out.
    s = _mm(sbf_ref[...], w_sbf12)
    o_ref[...] = xg_ref[...].astype(jnp.float32) * s


def _make_int_post_kernel(H, num_before, num_after, pack_w):
    # lin_up + skip + residual stacks + lin + skip; next output block's edge term fused.
    def kern(*refs):
        ep_ref, xkj_ref, xprev_ref, rbf_ref = refs[:4]
        pos = 4
        w_up = refs[pos]; pos += 1
        before = [refs[pos + 4 * k: pos + 4 * k + 4] for k in range(num_before)]
        pos += 4 * num_before
        w_lin, b_lin = refs[pos], refs[pos + 1]; pos += 2
        after = [refs[pos + 4 * k: pos + 4 * k + 4] for k in range(num_after)]
        pos += 4 * num_after
        w_rbf_o = refs[pos]; pos += 1
        o_ref = refs[pos]

        def residual(h, layer):
            w1, b1, w2, b2 = layer
            t = _swish(_mm(h, w1) + b1[...])
            t = _swish(_mm(t, w2) + b2[...])
            return h + t

        h = ep_ref[...][:, :H].astype(jnp.float32) + _swish(_mm(xkj_ref[...], w_up))
        for layer in before:
            h = residual(h, layer)
        h = _swish(_mm(h, w_lin) + b_lin[...]) + xprev_ref[...][:, :H].astype(jnp.float32)
        for layer in after:
            h = residual(h, layer)
        g = _mm(rbf_ref[...], w_rbf_o) * h       # next output block's lin_rbf(rbf)*x
        _pack_store(o_ref, [h, g], pack_w)
    return kern


def _make_out_node_kernel(num_layers):
    # lin_up + num_output_layers lins + final lin; lane-dense 128-padded f32 output.
    def kern(*refs):
        g_ref = refs[0]
        pos = 1
        w_up, b_up = refs[pos], refs[pos + 1]; pos += 2
        lins = [refs[pos + 2 * k: pos + 2 * k + 2] for k in range(num_layers)]
        pos += 2 * num_layers
        w_out = refs[pos]; pos += 1
        o_ref = refs[pos]

        g = _mm(g_ref[...], w_up) + b_up[...]
        for (w, b) in lins:
            g = _swish(_mm(g, w) + b[...])
        o_ref[...] = _mm(g, w_out)
    return kern


# ------------------------------ parameter init ---------------------------------

def init_params(key, cfg):
    keys = iter(jax.random.split(key, 1024))
    nk = lambda: next(keys)
    H, I, B = cfg["hidden"], cfg["int_emb"], cfg["basis_emb"]
    OE, S, R = cfg["out_emb"], cfg["num_spherical"], cfg["num_radial"]
    C = cfg["out_channels"]
    C_pad = _pack_width(C)

    def Wf(din, dout, scale=2.0):
        # glorot_orthogonal approximated by a glorot-scaled normal (synthetic init)
        return jax.random.normal(nk(), (din, dout), jnp.float32) * np.sqrt(scale / (din + dout))

    def W(din, dout, scale=2.0):
        return Wf(din, dout, scale).astype(jnp.bfloat16)

    def Bz(d):
        return jnp.zeros((1, d), jnp.float32)

    def res_layer():
        return (W(H, H), Bz(H), W(H, H), Bz(H))

    def out_block():
        # TODO(synk): reference zero-inits the final lin weight; keep it random so the
        # smoke test produces a non-trivial finite output. Padded to 128 lanes.
        w_out = jnp.zeros((OE, C_pad), jnp.bfloat16).at[:, :C].set(W(OE, C))
        return {"w_rbf": W(R, H),
                "w_up": W(H, OE), "b_up": Bz(OE),
                "lins": [(W(OE, OE), Bz(OE)) for _ in range(cfg["num_output_layers"])],
                "w_out": w_out}

    def int_block():
        return {"w_jikj": jnp.concatenate([W(H, H), W(H, H)], axis=1),  # lin_ji | lin_kj
                "b_jikj": Bz(2 * H),
                # algebraic fusion of the bias-free basis chains (f32 product, bf16 cast)
                "w_rbf12": (Wf(R, B) @ Wf(B, H)).astype(jnp.bfloat16),
                "w_sbf12": (Wf(S * R, B) @ Wf(B, I)).astype(jnp.bfloat16),
                "w_down": W(H, I), "w_up": W(I, H),
                "before": [res_layer() for _ in range(cfg["num_before_skip"])],
                "w_lin": W(H, H), "b_lin": Bz(H),
                "after": [res_layer() for _ in range(cfg["num_after_skip"])]}

    params = {
        "emb": {"table": jax.random.uniform(nk(), (cfg["node_class"], H), jnp.float32,
                                            -np.sqrt(3.0), np.sqrt(3.0)),
                "w_rbf": W(R, H), "b_rbf": Bz(H),
                "w_cat": W(3 * H, H), "b_lin": Bz(H)},
        "out": [out_block() for _ in range(cfg["num_blocks"] + 1)],
        "int": [int_block() for _ in range(cfg["num_blocks"])],
        "rbf_freq": jnp.arange(1, R + 1, dtype=jnp.float32) * np.pi,
    }
    return params


# --------------------------------- basis fns -----------------------------------

def _envelope(x, exponent):
    # NOTE: finite only because the radius graph guarantees 0 < d < cutoff.
    p = exponent + 1
    a = -(p + 1) * (p + 2) / 2.0
    b = p * (p + 2)
    c = -p * (p + 1) / 2.0
    return 1.0 / x + a * x ** (p - 1) + b * x ** p + c * x ** (p + 1)


def bessel_rbf(dist, freq, cutoff, exponent):
    d = dist / cutoff
    return _envelope(d, exponent)[:, None] * jnp.sin(freq[None, :] * d[:, None])


def spherical_sbf(dist, angle, idx_kj, cutoff, exponent, num_spherical, num_radial):
    # TODO(synk): the sympy-generated spherical Bessel radial functions (roots z_ln of
    # j_l) are approximated by sin(n*pi*d); the angular part uses exact Y_l^0(angle).
    d = dist / cutoff
    n = jnp.arange(1, num_radial + 1, dtype=jnp.float32)
    rad = _envelope(d, exponent)[:, None] * jnp.sin(n[None, :] * np.pi * d[:, None])  # [E,R]
    cz = jnp.cos(angle)
    ps = [jnp.ones_like(cz), cz]
    for l in range(2, num_spherical):
        ps.append(((2 * l - 1) * cz * ps[-1] - (l - 1) * ps[-2]) / l)
    pref = jnp.asarray([np.sqrt((2 * l + 1) / (4 * np.pi)) for l in range(num_spherical)],
                       jnp.float32)
    cbf = jnp.stack(ps[:num_spherical], axis=-1) * pref[None, :]      # [T,S]
    out = rad[idx_kj][:, None, :] * cbf[:, :, None]                   # [T,S,R]
    return out.reshape(-1, num_spherical * num_radial)


# -------------------------------- full forward ----------------------------------

def dimenet_forward(params, z, pos, batch, i, j,
                    idx_i, idx_j, idx_k, idx_kj, idx_ji, num_graphs, cfg):
    N = pos.shape[0]
    E = i.shape[0]
    T = idx_kj.shape[0]
    H, I = cfg["hidden"], cfg["int_emb"]
    pack_x = _pack_width(H, H)      # [x | g]       packed activation (lane-dense)
    pack_e = _pack_width(H, I)      # [x_ji | x_kj] packed activation (lane-dense)

    # geometry + basis on the *unpadded* edge/triplet sets (keeps 1/x envelope finite)
    dist = jnp.sqrt(jnp.sum((pos[i] - pos[j]) ** 2, axis=-1))
    pos_i = pos[idx_i]
    pos_ji = pos[idx_j] - pos_i
    pos_kj = pos[idx_k] - pos[idx_j]
    a = jnp.sum(pos_ji * pos_kj, axis=-1)
    b = jnp.linalg.norm(jnp.cross(pos_ji, pos_kj), axis=-1)
    angle = jnp.arctan2(b, a)

    rbf = bessel_rbf(dist, params["rbf_freq"], cfg["cutoff"], cfg["envelope_exponent"])
    sbf = spherical_sbf(dist, angle, idx_kj, cfg["cutoff"], cfg["envelope_exponent"],
                        cfg["num_spherical"], cfg["num_radial"])

    # pad rows ONCE; rbf/sbf/x stay padded through the whole block loop.
    # zero rbf/sbf rows => padded edges/triplets contribute exactly 0 to every scatter.
    tile_e, E_pad = _tile_and_pad(E)
    tile_t, T_pad = _tile_and_pad(T)
    tile_n, N_pad = _tile_and_pad(N)

    rbf_p = jnp.pad(rbf, ((0, E_pad - E), (0, 0)))
    sbf_p = jnp.pad(sbf, ((0, T_pad - T), (0, 0)))
    i_p = jnp.pad(i, (0, E_pad - E), constant_values=N - 1)             # keeps sortedness
    j_p = jnp.pad(j, (0, E_pad - E), constant_values=0)
    idx_kj_p = jnp.pad(idx_kj, (0, T_pad - T), constant_values=0)
    idx_ji_p = jnp.pad(idx_ji, (0, T_pad - T), constant_values=max(E - 1, 0))
    batch_p = jnp.pad(batch, (0, N_pad - N), constant_values=num_graphs)

    h = params["emb"]["table"][z].astype(jnp.bfloat16)                  # [N,H]
    h_i, h_j = h[i_p], h[j_p]                                           # [E_pad,H] bf16

    emb = params["emb"]
    xpack = _run_rowwise(
        _make_emb_kernel(H, pack_x), [h_i, h_j, rbf_p],
        [emb["w_rbf"], emb["b_rbf"], emb["w_cat"], emb["b_lin"],
         params["out"][0]["w_rbf"]],
        [(pack_x, jnp.bfloat16)], tile_e)

    def node_readout(out_p, xpack):
        # g = lin_rbf(rbf) * x is already in lanes [H:2H] of the packed activation.
        g = jax.ops.segment_sum(xpack[:, H:2 * H].astype(jnp.float32), i_p,
                                num_segments=N_pad, indices_are_sorted=True)
        residents = [out_p["w_up"], out_p["b_up"]]
        for (w, bias) in out_p["lins"]:
            residents += [w, bias]
        residents += [out_p["w_out"]]
        return _run_rowwise(_make_out_node_kernel(len(out_p["lins"])), [g], residents,
                            [(out_p["w_out"].shape[1], jnp.float32)], tile_n)

    def interaction(p_int, xpack, w_rbf_next):
        epack = _run_rowwise(
            _make_int_edge_kernel(H, I, pack_e), [xpack, rbf_p],
            [p_int["w_jikj"], p_int["b_jikj"], p_int["w_rbf12"], p_int["w_down"]],
            [(pack_e, jnp.bfloat16)], tile_e)

        xg = epack[:, H:H + I][idx_kj_p]                   # bf16 gather (half bandwidth)
        t = _run_rowwise(_sbf_mul_kernel, [xg, sbf_p], [p_int["w_sbf12"]],
                         [(I, jnp.float32)], tile_t)
        x_kj = jax.ops.segment_sum(t, idx_ji_p, num_segments=E_pad,
                                   indices_are_sorted=True)

        residents = [p_int["w_up"]]
        for layer in p_int["before"]:
            residents += list(layer)
        residents += [p_int["w_lin"], p_int["b_lin"]]
        for layer in p_int["after"]:
            residents += list(layer)
        residents += [w_rbf_next]
        return _run_rowwise(
            _make_int_post_kernel(H, len(p_int["before"]), len(p_int["after"]), pack_x),
            [epack, x_kj, xpack, rbf_p], residents, [(pack_x, jnp.bfloat16)], tile_e)

    P = node_readout(params["out"][0], xpack)
    for blk in range(cfg["num_blocks"]):
        xpack = interaction(params["int"][blk], xpack, params["out"][blk + 1]["w_rbf"])
        P = P + node_readout(params["out"][blk + 1], xpack)
    P = P / (cfg["num_blocks"] + 1)

    out = jax.ops.segment_sum(P, batch_p, num_segments=num_graphs + 1,
                              indices_are_sorted=True)                  # readout='add'
    return out[:num_graphs, :cfg["out_channels"]]                       # single final slice


# -------------------------- host-side graph construction ------------------------

def build_radius_graph(pos_np, batch_np, cutoff):
    N = pos_np.shape[0]
    j_list, i_list = [], []
    for a in range(N):
        for b in range(N):
            if a == b or batch_np[a] != batch_np[b]:
                continue
            if np.linalg.norm(pos_np[a] - pos_np[b]) < cutoff:
                j_list.append(b)     # source j
                i_list.append(a)     # target i
    return np.asarray(j_list, np.int32), np.asarray(i_list, np.int32)


def build_triplets(j_np, i_np, num_nodes):
    E = j_np.shape[0]
    incoming = [[] for _ in range(num_nodes)]      # edges (k -> t) per target t
    for e in range(E):
        incoming[i_np[e]].append((e, j_np[e]))
    idx_i, idx_j, idx_k, idx_kj, idx_ji = [], [], [], [], []
    for e in range(E):
        jj, ii = j_np[e], i_np[e]
        for (ekj, k) in incoming[jj]:
            if k == ii:
                continue
            idx_i.append(ii); idx_j.append(jj); idx_k.append(k)
            idx_kj.append(ekj); idx_ji.append(e)
    return tuple(np.asarray(t, np.int32) for t in (idx_i, idx_j, idx_k, idx_kj, idx_ji))


# ------------------------------------- main --------------------------------------

if __name__ == "__main__":
    cfg = dict(node_class=16, hidden=32, out_channels=4, num_blocks=2,
               int_emb=16, basis_emb=8, out_emb=32, num_spherical=7, num_radial=6,
               cutoff=5.0, envelope_exponent=5, num_before_skip=1, num_after_skip=2,
               num_output_layers=3)

    key = jax.random.PRNGKey(0)
    kz, kp, kparam = jax.random.split(key, 3)

    num_nodes, num_graphs = 10, 2
    z_np = np.asarray(jax.random.randint(kz, (num_nodes,), 0, cfg["node_class"]),
                      dtype=np.int32)
    pos_np = np.asarray(jax.random.uniform(kp, (num_nodes, 3), jnp.float32, -1.5, 1.5))
    batch_np = np.asarray([0] * 5 + [1] * 5, dtype=np.int32)

    j_np, i_np = build_radius_graph(pos_np, batch_np, cfg["cutoff"])
    idx_i, idx_j, idx_k, idx_kj, idx_ji = build_triplets(j_np, i_np, num_nodes)

    params = init_params(kparam, cfg)

    fwd = jax.jit(lambda p_, z_, pos_, b_, i_, j_, a1, a2, a3, a4, a5:
                  dimenet_forward(p_, z_, pos_, b_, i_, j_, a1, a2, a3, a4, a5,
                                  num_graphs, cfg))

    out = fwd(params,
              jnp.asarray(z_np), jnp.asarray(pos_np), jnp.asarray(batch_np),
              jnp.asarray(i_np), jnp.asarray(j_np),
              jnp.asarray(idx_i), jnp.asarray(idx_j), jnp.asarray(idx_k),
              jnp.asarray(idx_kj), jnp.asarray(idx_ji))

    out = jax.block_until_ready(out)
    assert out.shape == (num_graphs, cfg["out_channels"])
    assert bool(jnp.all(jnp.isfinite(out)))
    print("KERNEL_OK")
</pallas_src>

<mosaic_0001>
module attributes {stable_mosaic.version = 11 : i64} {
  func.func @kern(%arg0: i32, %arg1: memref<32x128xbf16, #tpu.memory_space<vmem>>, %arg2: memref<32x6xf32, #tpu.memory_space<vmem>>, %arg3: memref<32x64xbf16, #tpu.memory_space<vmem>>, %arg4: memref<1x64xf32, #tpu.memory_space<vmem>>, %arg5: memref<6x32xbf16, #tpu.memory_space<vmem>>, %arg6: memref<32x16xbf16, #tpu.memory_space<vmem>>, %arg7: memref<32x128xbf16, #tpu.memory_space<vmem>>) attributes {dimension_semantics = [#tpu.dimension_semantics<parallel>], iteration_bounds = array<i64: 2>, scalar_prefetch = 0 : i64, scratch_operands = 0 : i64, tpu.core_type = #tpu.core_type<tc>, window_params = [{transform_indices = @transform_0, window_bounds = array<i64: 32, 128>}, {transform_indices = @transform_1, window_bounds = array<i64: 32, 6>}, {pipeline_mode = #tpu.pipeline_mode<synchronous>, transform_indices = @transform_2, window_bounds = array<i64: 32, 64>}, {pipeline_mode = #tpu.pipeline_mode<synchronous>, transform_indices = @transform_3, window_bounds = array<i64: 1, 64>}, {pipeline_mode = #tpu.pipeline_mode<synchronous>, transform_indices = @transform_4, window_bounds = array<i64: 6, 32>}, {pipeline_mode = #tpu.pipeline_mode<synchronous>, transform_indices = @transform_5, window_bounds = array<i64: 32, 16>}, {transform_indices = @transform_6, window_bounds = array<i64: 32, 128>}]} {
    %c0 = arith.constant 0 : index
    %c0_0 = arith.constant 0 : index
    %0 = vector.load %arg1[%c0, %c0_0] : memref<32x128xbf16, #tpu.memory_space<vmem>>, vector<32x128xbf16>
    %1 = vector.extract_strided_slice %0 {offsets = [0, 0], sizes = [32, 32], strides = [1, 1]} : vector<32x128xbf16> to vector<32x32xbf16>
    %c0_1 = arith.constant 0 : index
    %c0_2 = arith.constant 0 : index
    %2 = vector.load %arg3[%c0_1, %c0_2] : memref<32x64xbf16, #tpu.memory_space<vmem>>, vector<32x64xbf16>
    %cst = arith.constant dense<0.000000e+00> : vector<32x64xf32>
    %3 = tpu.matmul %1, %2, %cst {dimension_numbers = #tpu.dot_dimension_numbers<[1], [0], [0], [1], [0, 0, 1, 1], [], []>} : vector<32x32xbf16>, vector<32x64xbf16>, vector<32x64xf32> -> vector<32x64xf32>
    %c0_3 = arith.constant 0 : index
    %c0_4 = arith.constant 0 : index
    %4 = vector.load %arg4[%c0_3, %c0_4] : memref<1x64xf32, #tpu.memory_space<vmem>>, vector<1x64xf32>
    %5 = vector.broadcast %4 : vector<1x64xf32> to vector<32x64xf32>
    %6 = arith.addf %3, %5 : vector<32x64xf32>
    %7 = arith.negf %6 : vector<32x64xf32>
    %8 = math.exp %7 : vector<32x64xf32>
    %cst_5 = arith.constant 1.000000e+00 : f32
    %9 = vector.broadcast %cst_5 : f32 to vector<32x64xf32>
    %10 = arith.addf %9, %8 : vector<32x64xf32>
    %11 = arith.divf %9, %10 : vector<32x64xf32>
    %12 = arith.mulf %6, %11 : vector<32x64xf32>
    %c0_6 = arith.constant 0 : index
    %c0_7 = arith.constant 0 : index
    %13 = vector.load %arg2[%c0_6, %c0_7] : memref<32x6xf32, #tpu.memory_space<vmem>>, vector<32x6xf32>
    %14 = arith.truncf %13 : vector<32x6xf32> to vector<32x6xbf16>
    %c0_8 = arith.constant 0 : index
    %c0_9 = arith.constant 0 : index
    %15 = vector.load %arg5[%c0_8, %c0_9] : memref<6x32xbf16, #tpu.memory_space<vmem>>, vector<6x32xbf16>
    %cst_10 = arith.constant dense<0.000000e+00> : vector<32x32xf32>
    %16 = tpu.matmul %14, %15, %cst_10 {dimension_numbers = #tpu.dot_dimension_numbers<[1], [0], [0], [1], [0, 0, 1, 1], [], []>} : vector<32x6xbf16>, vector<6x32xbf16>, vector<32x32xf32> -> vector<32x32xf32>
    %17 = vector.extract_strided_slice %12 {offsets = [0, 32], sizes = [32, 32], strides = [1, 1]} : vector<32x64xf32> to vector<32x32xf32>
    %18 = arith.mulf %17, %16 : vector<32x32xf32>
    %19 = arith.truncf %18 : vector<32x32xf32> to vector<32x32xbf16>
    %c0_11 = arith.constant 0 : index
    %c0_12 = arith.constant 0 : index
    %20 = vector.load %arg6[%c0_11, %c0_12] : memref<32x16xbf16, #tpu.memory_space<vmem>>, vector<32x16xbf16>
    %cst_13 = arith.constant dense<0.000000e+00> : vector<32x16xf32>
    %21 = tpu.matmul %19, %20, %cst_13 {dimension_numbers = #tpu.dot_dimension_numbers<[1], [0], [0], [1], [0, 0, 1, 1], [], []>} : vector<32x32xbf16>, vector<32x16xbf16>, vector<32x16xf32> -> vector<32x16xf32>
    %22 = arith.negf %21 : vector<32x16xf32>
    %23 = math.exp %22 : vector<32x16xf32>
    %cst_14 = arith.constant 1.000000e+00 : f32
    %24 = vector.broadcast %cst_14 : f32 to vector<32x16xf32>
    %25 = arith.addf %24, %23 : vector<32x16xf32>
    %26 = arith.divf %24, %25 : vector<32x16xf32>
    %27 = arith.mulf %21, %26 : vector<32x16xf32>
    %28 = vector.extract_strided_slice %12 {offsets = [0, 0], sizes = [32, 32], strides = [1, 1]} : vector<32x64xf32> to vector<32x32xf32>
    %cst_15 = arith.constant 0.000000e+00 : f32
    %29 = vector.broadcast %cst_15 : f32 to vector<32x80xf32>
    %30 = tpu.concatenate %28, %27, %29 in 1 : vector<32x32xf32>, vector<32x16xf32>, vector<32x80xf32> -> vector<32x128xf32>
    %31 = arith.truncf %30 : vector<32x128xf32> to vector<32x128xbf16>
    %c0_16 = arith.constant 0 : index
    %c0_17 = arith.constant 0 : index
    %32 = vector.load %arg7[%c0_16, %c0_17] : memref<32x128xbf16, #tpu.memory_space<vmem>>, vector<32x128xbf16>
    tpu.vector_store %arg7[%c0_16, %c0_17], %31 {strides = array<i32>} : memref<32x128xbf16, #tpu.memory_space<vmem>>, vector<32x128xbf16>,
    return
  }
  func.func @transform_0(%arg0: i32) -> (i32, i32) {
    %c0_i32 = arith.constant 0 : i32
    %c0_i32_0 = arith.constant 0 : i32
    return %arg0, %c0_i32 : i32, i32
  }
  func.func @transform_1(%arg0: i32) -> (i32, i32) {
    %c0_i32 = arith.constant 0 : i32
    %c0_i32_0 = arith.constant 0 : i32
    return %arg0, %c0_i32 : i32, i32
  }
  func.func @transform_2(%arg0: i32) -> (i32, i32) {
    %c0_i32 = arith.constant 0 : i32
    %c0_i32_0 = arith.constant 0 : i32
    %c0_i32_1 = arith.constant 0 : i32
    return %c0_i32, %c0_i32_0 : i32, i32
  }
  func.func @transform_3(%arg0: i32) -> (i32, i32) {
    %c0_i32 = arith.constant 0 : i32
    %c0_i32_0 = arith.constant 0 : i32
    %c0_i32_1 = arith.constant 0 : i32
    return %c0_i32, %c0_i32_0 : i32, i32
  }
  func.func @transform_4(%arg0: i32) -> (i32, i32) {
    %c0_i32 = arith.constant 0 : i32
    %c0_i32_0 = arith.constant 0 : i32
    %c0_i32_1 = arith.constant 0 : i32
    return %c0_i32, %c0_i32_0 : i32, i32
  }
  func.func @transform_5(%arg0: i32) -> (i32, i32) {
    %c0_i32 = arith.constant 0 : i32
    %c0_i32_0 = arith.constant 0 : i32
    %c0_i32_1 = arith.constant 0 : i32
    return %c0_i32, %c0_i32_0 : i32, i32
  }
  func.func @transform_6(%arg0: i32) -> (i32, i32) {
    %c0_i32 = arith.constant 0 : i32
    %c0_i32_0 = arith.constant 0 : i32
    return %arg0, %c0_i32 : i32, i32
  }
}

module attributes {stable_mosaic.version = 11 : i64} {
  func.func @kern(%arg0: i32, %arg1: memref<32x32xbf16, #tpu.memory_space<vmem>>, %arg2: memref<32x32xbf16, #tpu.memory_space<vmem>>, %arg3: memref<32x6xf32, #tpu.memory_space<vmem>>, %arg4: memref<6x32xbf16, #tpu.memory_space<vmem>>, %arg5: memref<1x32xf32, #tpu.memory_space<vmem>>, %arg6: memref<96x32xbf16, #tpu.memory_space<vmem>>, %arg7: memref<1x32xf32, #tpu.memory_space<vmem>>, %arg8: memref<6x32xbf16, #tpu.memory_space<vmem>>, %arg9: memref<32x128xbf16, #tpu.memory_space<vmem>>) attributes {dimension_semantics = [#tpu.dimension_semantics<parallel>], iteration_bounds = array<i64: 2>, scalar_prefetch = 0 : i64, scratch_operands = 0 : i64, tpu.core_type = #tpu.core_type<tc>, window_params = [{transform_indices = @transform_0, window_bounds = array<i64: 32, 32>}, {transform_indices = @transform_1, window_bounds = array<i64: 32, 32>}, {transform_indices = @transform_2, window_bounds = array<i64: 32, 6>}, {pipeline_mode = #tpu.pipeline_mode<synchronous>, transform_indices = @transform_3, window_bounds = array<i64: 6, 32>}, {pipeline_mode = #tpu.pipeline_mode<synchronous>, transform_indices = @transform_4, window_bounds = array<i64: 1, 32>}, {pipeline_mode = #tpu.pipeline_mode<synchronous>, transform_indices = @transform_5, window_bounds = array<i64: 96, 32>}, {pipeline_mode = #tpu.pipeline_mode<synchronous>, transform_indices = @transform_6, window_bounds = array<i64: 1, 32>}, {pipeline_mode = #tpu.pipeline_mode<synchronous>, transform_indices = @transform_7, window_bounds = array<i64: 6, 32>}, {transform_indices = @transform_8, window_bounds = array<i64: 32, 128>}]} {
    %c0 = arith.constant 0 : index
    %c0_0 = arith.constant 0 : index
    %0 = vector.load %arg3[%c0, %c0_0] : memref<32x6xf32, #tpu.memory_space<vmem>>, vector<32x6xf32>
    %1 = arith.truncf %0 : vector<32x6xf32> to vector<32x6xbf16>
    %c0_1 = arith.constant 0 : index
    %c0_2 = arith.constant 0 : index
    %2 = vector.load %arg4[%c0_1, %c0_2] : memref<6x32xbf16, #tpu.memory_space<vmem>>, vector<6x32xbf16>
    %cst = arith.constant dense<0.000000e+00> : vector<32x32xf32>
    %3 = tpu.matmul %1, %2, %cst {dimension_numbers = #tpu.dot_dimension_numbers<[1], [0], [0], [1], [0, 0, 1, 1], [], []>} : vector<32x6xbf16>, vector<6x32xbf16>, vector<32x32xf32> -> vector<32x32xf32>
    %c0_3 = arith.constant 0 : index
    %c0_4 = arith.constant 0 : index
    %4 = vector.load %arg5[%c0_3, %c0_4] : memref<1x32xf32, #tpu.memory_space<vmem>>, vector<1x32xf32>
    %5 = vector.broadcast %4 : vector<1x32xf32> to vector<32x32xf32>
    %6 = arith.addf %3, %5 : vector<32x32xf32>
    %7 = arith.negf %6 : vector<32x32xf32>
    %8 = math.exp %7 : vector<32x32xf32>
    %cst_5 = arith.constant 1.000000e+00 : f32
    %9 = vector.broadcast %cst_5 : f32 to vector<32x32xf32>
    %10 = arith.addf %9, %8 : vector<32x32xf32>
    %11 = arith.divf %9, %10 : vector<32x32xf32>
    %12 = arith.mulf %6, %11 : vector<32x32xf32>
    %c0_6 = arith.constant 0 : index
    %c0_7 = arith.constant 0 : index
    %13 = vector.load %arg1[%c0_6, %c0_7] : memref<32x32xbf16, #tpu.memory_space<vmem>>, vector<32x32xbf16>
    %c0_8 = arith.constant 0 : index
    %c0_9 = arith.constant 0 : index
    %14 = vector.load %arg2[%c0_8, %c0_9] : memref<32x32xbf16, #tpu.memory_space<vmem>>, vector<32x32xbf16>
    %15 = arith.truncf %12 : vector<32x32xf32> to vector<32x32xbf16>
    %16 = tpu.concatenate %13, %14, %15 in 1 : vector<32x32xbf16>, vector<32x32xbf16>, vector<32x32xbf16> -> vector<32x96xbf16>
    %c0_10 = arith.constant 0 : index
    %c0_11 = arith.constant 0 : index
    %17 = vector.load %arg6[%c0_10, %c0_11] : memref<96x32xbf16, #tpu.memory_space<vmem>>, vector<96x32xbf16>
    %cst_12 = arith.constant dense<0.000000e+00> : vector<32x32xf32>
    %18 = tpu.matmul %16, %17, %cst_12 {dimension_numbers = #tpu.dot_dimension_numbers<[1], [0], [0], [1], [0, 0, 1, 1], [], []>} : vector<32x96xbf16>, vector<96x32xbf16>, vector<32x32xf32> -> vector<32x32xf32>
    %c0_13 = arith.constant 0 : index
    %c0_14 = arith.constant 0 : index
    %19 = vector.load %arg7[%c0_13, %c0_14] : memref<1x32xf32, #tpu.memory_space<vmem>>, vector<1x32xf32>
    %20 = vector.broadcast %19 : vector<1x32xf32> to vector<32x32xf32>
    %21 = arith.addf %18, %20 : vector<32x32xf32>
    %22 = arith.negf %21 : vector<32x32xf32>
    %23 = math.exp %22 : vector<32x32xf32>
    %cst_15 = arith.constant 1.000000e+00 : f32
    %24 = vector.broadcast %cst_15 : f32 to vector<32x32xf32>
    %25 = arith.addf %24, %23 : vector<32x32xf32>
    %26 = arith.divf %24, %25 : vector<32x32xf32>
    %27 = arith.mulf %21, %26 : vector<32x32xf32>
    %28 = arith.truncf %0 : vector<32x6xf32> to vector<32x6xbf16>
    %c0_16 = arith.constant 0 : index
    %c0_17 = arith.constant 0 : index
    %29 = vector.load %arg8[%c0_16, %c0_17] : memref<6x32xbf16, #tpu.memory_space<vmem>>, vector<6x32xbf16>
    %cst_18 = arith.constant dense<0.000000e+00> : vector<32x32xf32>
    %30 = tpu.matmul %28, %29, %cst_18 {dimension_numbers = #tpu.dot_dimension_numbers<[1], [0], [0], [1], [0, 0, 1, 1], [], []>} : vector<32x6xbf16>, vector<6x32xbf16>, vector<32x32xf32> -> vector<32x32xf32>
    %31 = arith.mulf %30, %27 : vector<32x32xf32>
    %cst_19 = arith.constant 0.000000e+00 : f32
    %32 = vector.broadcast %cst_19 : f32 to vector<32x64xf32>
    %33 = tpu.concatenate %27, %31, %32 in 1 : vector<32x32xf32>, vector<32x32xf32>, vector<32x64xf32> -> vector<32x128xf32>
    %34 = arith.truncf %33 : vector<32x128xf32> to vector<32x128xbf16>
    %c0_20 = arith.constant 0 : index
    %c0_21 = arith.constant 0 : index
    %35 = vector.load %arg9[%c0_20, %c0_21] : memref<32x128xbf16, #tpu.memory_space<vmem>>, vector<32x128xbf16>
    tpu.vector_store %arg9[%c0_20, %c0_21], %34 {strides = array<i32>} : memref<32x128xbf16, #tpu.memory_space<vmem>>, vector<32x128xbf16>,
    return
  }
  func.func @transform_0(%arg0: i32) -> (i32, i32) {
    %c0_i32 = arith.constant 0 : i32
    %c0_i32_0 = arith.constant 0 : i32
    return %arg0, %c0_i32 : i32, i32
  }
  func.func @transform_1(%arg0: i32) -> (i32, i32) {
    %c0_i32 = arith.constant 0 : i32
    %c0_i32_0 = arith.constant 0 : i32
    return %arg0, %c0_i32 : i32, i32
  }
  func.func @transform_2(%arg0: i32) -> (i32, i32) {
    %c0_i32 = arith.constant 0 : i32
    %c0_i32_0 = arith.constant 0 : i32
    return %arg0, %c0_i32 : i32, i32
  }
  func.func @transform_3(%arg0: i32) -> (i32, i32) {
    %c0_i32 = arith.constant 0 : i32
    %c0_i32_0 = arith.constant 0 : i32
    %c0_i32_1 = arith.constant 0 : i32
    return %c0_i32, %c0_i32_0 : i32, i32
  }
  func.func @transform_4(%arg0: i32) -> (i32, i32) {
    %c0_i32 = arith.constant 0 : i32
    %c0_i32_0 = arith.constant 0 : i32
    %c0_i32_1 = arith.constant 0 : i32
    return %c0_i32, %c0_i32_0 : i32, i32
  }
  func.func @transform_5(%arg0: i32) -> (i32, i32) {
    %c0_i32 = arith.constant 0 : i32
    %c0_i32_0 = arith.constant 0 : i32
    %c0_i32_1 = arith.constant 0 : i32
    return %c0_i32, %c0_i32_0 : i32, i32
  }
  func.func @transform_6(%arg0: i32) -> (i32, i32) {
    %c0_i32 = arith.constant 0 : i32
    %c0_i32_0 = arith.constant 0 : i32
    %c0_i32_1 = arith.constant 0 : i32
    return %c0_i32, %c0_i32_0 : i32, i32
  }
  func.func @transform_7(%arg0: i32) -> (i32, i32) {
    %c0_i32 = arith.constant 0 : i32
    %c0_i32_0 = arith.constant 0 : i32
    %c0_i32_1 = arith.constant 0 : i32
    return %c0_i32, %c0_i32_0 : i32, i32
  }
  func.func @transform_8(%arg0: i32) -> (i32, i32) {
    %c0_i32 = arith.constant 0 : i32
    %c0_i32_0 = arith.constant 0 : i32
    return %arg0, %c0_i32 : i32, i32
  }
}

module attributes {stable_mosaic.version = 11 : i64} {
  func.func @_sbf_mul_kernel(%arg0: i32, %arg1: memref<64x16xbf16, #tpu.memory_space<vmem>>, %arg2: memref<64x42xf32, #tpu.memory_space<vmem>>, %arg3: memref<42x16xbf16, #tpu.memory_space<vmem>>, %arg4: memref<64x16xf32, #tpu.memory_space<vmem>>) attributes {dimension_semantics = [#tpu.dimension_semantics<parallel>], iteration_bounds = array<i64: 2>, scalar_prefetch = 0 : i64, scratch_operands = 0 : i64, tpu.core_type = #tpu.core_type<tc>, window_params = [{transform_indices = @transform_0, window_bounds = array<i64: 64, 16>}, {transform_indices = @transform_1, window_bounds = array<i64: 64, 42>}, {pipeline_mode = #tpu.pipeline_mode<synchronous>, transform_indices = @transform_2, window_bounds = array<i64: 42, 16>}, {transform_indices = @transform_3, window_bounds = array<i64: 64, 16>}]} {
    %c0 = arith.constant 0 : index
    %c0_0 = arith.constant 0 : index
    %0 = vector.load %arg2[%c0, %c0_0] : memref<64x42xf32, #tpu.memory_space<vmem>>, vector<64x42xf32>
    %1 = arith.truncf %0 : vector<64x42xf32> to vector<64x42xbf16>
    %c0_1 = arith.constant 0 : index
    %c0_2 = arith.constant 0 : index
    %2 = vector.load %arg3[%c0_1, %c0_2] : memref<42x16xbf16, #tpu.memory_space<vmem>>, vector<42x16xbf16>
    %cst = arith.constant dense<0.000000e+00> : vector<64x16xf32>
    %3 = tpu.matmul %1, %2, %cst {dimension_numbers = #tpu.dot_dimension_numbers<[1], [0], [0], [1], [0, 0, 1, 1], [], []>} : vector<64x42xbf16>, vector<42x16xbf16>, vector<64x16xf32> -> vector<64x16xf32>
    %c0_3 = arith.constant 0 : index
    %c0_4 = arith.constant 0 : index
    %4 = vector.load %arg1[%c0_3, %c0_4] : memref<64x16xbf16, #tpu.memory_space<vmem>>, vector<64x16xbf16>
    %5 = arith.extf %4 : vector<64x16xbf16> to vector<64x16xf32>
    %6 = arith.mulf %5, %3 : vector<64x16xf32>
    %c0_5 = arith.constant 0 : index
    %c0_6 = arith.constant 0 : index
    %7 = vector.load %arg4[%c0_5, %c0_6] : memref<64x16xf32, #tpu.memory_space<vmem>>, vector<64x16xf32>
    tpu.vector_store %arg4[%c0_5, %c0_6], %6 {strides = array<i32>} : memref<64x16xf32, #tpu.memory_space<vmem>>, vector<64x16xf32>,
    return
  }
  func.func @transform_0(%arg0: i32) -> (i32, i32) {
    %c0_i32 = arith.constant 0 : i32
    %c0_i32_0 = arith.constant 0 : i32
    return %arg0, %c0_i32 : i32, i32
  }
  func.func @transform_1(%arg0: i32) -> (i32, i32) {
    %c0_i32 = arith.constant 0 : i32
    %c0_i32_0 = arith.constant 0 : i32
    return %arg0, %c0_i32 : i32, i32
  }
  func.func @transform_2(%arg0: i32) -> (i32, i32) {
    %c0_i32 = arith.constant 0 : i32
    %c0_i32_0 = arith.constant 0 : i32
    %c0_i32_1 = arith.constant 0 : i32
    return %c0_i32, %c0_i32_0 : i32, i32
  }
  func.func @transform_3(%arg0: i32) -> (i32, i32) {
    %c0_i32 = arith.constant 0 : i32
    %c0_i32_0 = arith.constant 0 : i32
    return %arg0, %c0_i32 : i32, i32
  }
}

module attributes {stable_mosaic.version = 11 : i64} {
  func.func @kern(%arg0: i32, %arg1: memref<32x128xbf16, #tpu.memory_space<vmem>>, %arg2: memref<32x16xf32, #tpu.memory_space<vmem>>, %arg3: memref<32x128xbf16, #tpu.memory_space<vmem>>, %arg4: memref<32x6xf32, #tpu.memory_space<vmem>>, %arg5: memref<16x32xbf16, #tpu.memory_space<vmem>>, %arg6: memref<32x32xbf16, #tpu.memory_space<vmem>>, %arg7: memref<1x32xf32, #tpu.memory_space<vmem>>, %arg8: memref<32x32xbf16, #tpu.memory_space<vmem>>, %arg9: memref<1x32xf32, #tpu.memory_space<vmem>>, %arg10: memref<32x32xbf16, #tpu.memory_space<vmem>>, %arg11: memref<1x32xf32, #tpu.memory_space<vmem>>, %arg12: memref<32x32xbf16, #tpu.memory_space<vmem>>, %arg13: memref<1x32xf32, #tpu.memory_space<vmem>>, %arg14: memref<32x32xbf16, #tpu.memory_space<vmem>>, %arg15: memref<1x32xf32, #tpu.memory_space<vmem>>, %arg16: memref<32x32xbf16, #tpu.memory_space<vmem>>, %arg17: memref<1x32xf32, #tpu.memory_space<vmem>>, %arg18: memref<32x32xbf16, #tpu.memory_space<vmem>>, %arg19: memref<1x32xf32, #tpu.memory_space<vmem>>, %arg20: memref<6x32xbf16, #tpu.memory_space<vmem>>, %arg21: memref<32x128xbf16, #tpu.memory_space<vmem>>) attributes {dimension_semantics = [#tpu.dimension_semantics<parallel>], iteration_bounds = array<i64: 2>, scalar_prefetch = 0 : i64, scratch_operands = 0 : i64, tpu.core_type = #tpu.core_type<tc>, window_params = [{transform_indices = @transform_0, window_bounds = array<i64: 32, 128>}, {transform_indices = @transform_1, window_bounds = array<i64: 32, 16>}, {transform_indices = @transform_2, window_bounds = array<i64: 32, 128>}, {transform_indices = @transform_3, window_bounds = array<i64: 32, 6>}, {pipeline_mode = #tpu.pipeline_mode<synchronous>, transform_indices = @transform_4, window_bounds = array<i64: 16, 32>}, {pipeline_mode = #tpu.pipeline_mode<synchronous>, transform_indices = @transform_5, window_bounds = array<i64: 32, 32>}, {pipeline_mode = #tpu.pipeline_mode<synchronous>, transform_indices = @transform_6, window_bounds = array<i64: 1, 32>}, {pipeline_mode = #tpu.pipeline_mode<synchronous>, transform_indices = @transform_7, window_bounds = array<i64: 32, 32>}, {pipeline_mode = #tpu.pipeline_mode<synchronous>, transform_indices = @transform_8, window_bounds = array<i64: 1, 32>}, {pipeline_mode = #tpu.pipeline_mode<synchronous>, transform_indices = @transform_9, window_bounds = array<i64: 32, 32>}, {pipeline_mode = #tpu.pipeline_mode<synchronous>, transform_indices = @transform_10, window_bounds = array<i64: 1, 32>}, {pipeline_mode = #tpu.pipeline_mode<synchronous>, transform_indices = @transform_11, window_bounds = array<i64: 32, 32>}, {pipeline_mode = #tpu.pipeline_mode<synchronous>, transform_indices = @transform_12, window_bounds = array<i64: 1, 32>}, {pipeline_mode = #tpu.pipeline_mode<synchronous>, transform_indices = @transform_13, window_bounds = array<i64: 32, 32>}, {pipeline_mode = #tpu.pipeline_mode<synchronous>, transform_indices = @transform_14, window_bounds = array<i64: 1, 32>}, {pipeline_mode = #tpu.pipeline_mode<synchronous>, transform_indices = @transform_15, window_bounds = array<i64: 32, 32>}, {pipeline_mode = #tpu.pipeline_mode<synchronous>, transform_indices = @transform_16, window_bounds = array<i64: 1, 32>}, {pipeline_mode = #tpu.pipeline_mode<synchronous>, transform_indices = @transform_17, window_bounds = array<i64: 32, 32>}, {pipeline_mode = #tpu.pipeline_mode<synchronous>, transform_indices = @transform_18, window_bounds = array<i64: 1, 32>}, {pipeline_mode = #tpu.pipeline_mode<synchronous>, transform_indices = @transform_19, window_bounds = array<i64: 6, 32>}, {transform_indices = @transform_20, window_bounds = array<i64: 32, 128>}]} {
    %c0 = arith.constant 0 : index
    %c0_0 = arith.constant 0 : index
    %0 = vector.load %arg1[%c0, %c0_0] : memref<32x128xbf16, #tpu.memory_space<vmem>>, vector<32x128xbf16>
    %1 = vector.extract_strided_slice %0 {offsets = [0, 0], sizes = [32, 32], strides = [1, 1]} : vector<32x128xbf16> to vector<32x32xbf16>
    %2 = arith.extf %1 : vector<32x32xbf16> to vector<32x32xf32>
    %c0_1 = arith.constant 0 : index
    %c0_2 = arith.constant 0 : index
    %3 = vector.load %arg2[%c0_1, %c0_2] : memref<32x16xf32, #tpu.memory_space<vmem>>, vector<32x16xf32>
    %4 = arith.truncf %3 : vector<32x16xf32> to vector<32x16xbf16>
    %c0_3 = arith.constant 0 : index
    %c0_4 = arith.constant 0 : index
    %5 = vector.load %arg5[%c0_3, %c0_4] : memref<16x32xbf16, #tpu.memory_space<vmem>>, vector<16x32xbf16>
    %cst = arith.constant dense<0.000000e+00> : vector<32x32xf32>
    %6 = tpu.matmul %4, %5, %cst {dimension_numbers = #tpu.dot_dimension_numbers<[1], [0], [0], [1], [0, 0, 1, 1], [], []>} : vector<32x16xbf16>, vector<16x32xbf16>, vector<32x32xf32> -> vector<32x32xf32>
    %7 = arith.negf %6 : vector<32x32xf32>
    %8 = math.exp %7 : vector<32x32xf32>
    %cst_5 = arith.constant 1.000000e+00 : f32
    %9 = vector.broadcast %cst_5 : f32 to vector<32x32xf32>
    %10 = arith.addf %9, %8 : vector<32x32xf32>
    %11 = arith.divf %9, %10 : vector<32x32xf32>
    %12 = arith.mulf %6, %11 : vector<32x32xf32>
    %13 = arith.addf %2, %12 : vector<32x32xf32>
    %14 = arith.truncf %13 : vector<32x32xf32> to vector<32x32xbf16>
    %c0_6 = arith.constant 0 : index
    %c0_7 = arith.constant 0 : index
    %15 = vector.load %arg6[%c0_6, %c0_7] : memref<32x32xbf16, #tpu.memory_space<vmem>>, vector<32x32xbf16>
    %cst_8 = arith.constant dense<0.000000e+00> : vector<32x32xf32>
    %16 = tpu.matmul %14, %15, %cst_8 {dimension_numbers = #tpu.dot_dimension_numbers<[1], [0], [0], [1], [0, 0, 1, 1], [], []>} : vector<32x32xbf16>, vector<32x32xbf16>, vector<32x32xf32> -> vector<32x32xf32>
    %c0_9 = arith.constant 0 : index
    %c0_10 = arith.constant 0 : index
    %17 = vector.load %arg7[%c0_9, %c0_10] : memref<1x32xf32, #tpu.memory_space<vmem>>, vector<1x32xf32>
    %18 = vector.broadcast %17 : vector<1x32xf32> to vector<32x32xf32>
    %19 = arith.addf %16, %18 : vector<32x32xf32>
    %20 = arith.negf %19 : vector<32x32xf32>
    %21 = math.exp %20 : vector<32x32xf32>
    %cst_11 = arith.constant 1.000000e+00 : f32
    %22 = vector.broadcast %cst_11 : f32 to vector<32x32xf32>
    %23 = arith.addf %22, %21 : vector<32x32xf32>
    %24 = arith.divf %22, %23 : vector<32x32xf32>
    %25 = arith.mulf %19, %24 : vector<32x32xf32>
    %26 = arith.truncf %25 : vector<32x32xf32> to vector<32x32xbf16>
    %c0_12 = arith.constant 0 : index
    %c0_13 = arith.constant 0 : index
    %27 = vector.load %arg8[%c0_12, %c0_13] : memref<32x32xbf16, #tpu.memory_space<vmem>>, vector<32x32xbf16>
    %cst_14 = arith.constant dense<0.000000e+00> : vector<32x32xf32>
    %28 = tpu.matmul %26, %27, %cst_14 {dimension_numbers = #tpu.dot_dimension_numbers<[1], [0], [0], [1], [0, 0, 1, 1], [], []>} : vector<32x32xbf16>, vector<32x32xbf16>, vector<32x32xf32> -> vector<32x32xf32>
    %c0_15 = arith.constant 0 : index
    %c0_16 = arith.constant 0 : index
    %29 = vector.load %arg9[%c0_15, %c0_16] : memref<1x32xf32, #tpu.memory_space<vmem>>, vector<1x32xf32>
    %30 = vector.broadcast %29 : vector<1x32xf32> to vector<32x32xf32>
    %31 = arith.addf %28, %30 : vector<32x32xf32>
    %32 = arith.negf %31 : vector<32x32xf32>
    %33 = math.exp %32 : vector<32x32xf32>
    %cst_17 = arith.constant 1.000000e+00 : f32
    %34 = vector.broadcast %cst_17 : f32 to vector<32x32xf32>
    %35 = arith.addf %34, %33 : vector<32x32xf32>
    %36 = arith.divf %34, %35 : vector<32x32xf32>
    %37 = arith.mulf %31, %36 : vector<32x32xf32>
    %38 = arith.addf %13, %37 : vector<32x32xf32>
    %39 = arith.truncf %38 : vector<32x32xf32> to vector<32x32xbf16>
    %c0_18 = arith.constant 0 : index
    %c0_19 = arith.constant 0 : index
    %40 = vector.load %arg10[%c0_18, %c0_19] : memref<32x32xbf16, #tpu.memory_space<vmem>>, vector<32x32xbf16>
    %cst_20 = arith.constant dense<0.000000e+00> : vector<32x32xf32>
    %41 = tpu.matmul %39, %40, %cst_20 {dimension_numbers = #tpu.dot_dimension_numbers<[1], [0], [0], [1], [0, 0, 1, 1], [], []>} : vector<32x32xbf16>, vector<32x32xbf16>, vector<32x32xf32> -> vector<32x32xf32>
    %c0_21 = arith.constant 0 : index
    %c0_22 = arith.constant 0 : index
    %42 = vector.load %arg11[%c0_21, %c0_22] : memref<1x32xf32, #tpu.memory_space<vmem>>, vector<1x32xf32>
    %43 = vector.broadcast %42 : vector<1x32xf32> to vector<32x32xf32>
    %44 = arith.addf %41, %43 : vector<32x32xf32>
    %45 = arith.negf %44 : vector<32x32xf32>
    %46 = math.exp %45 : vector<32x32xf32>
    %cst_23 = arith.constant 1.000000e+00 : f32
    %47 = vector.broadcast %cst_23 : f32 to vector<32x32xf32>
    %48 = arith.addf %47, %46 : vector<32x32xf32>
    %49 = arith.divf %47, %48 : vector<32x32xf32>
    %50 = arith.mulf %44, %49 : vector<32x32xf32>
    %c0_24 = arith.constant 0 : index
    %c0_25 = arith.constant 0 : index
    %51 = vector.load %arg3[%c0_24, %c0_25] : memref<32x128xbf16, #tpu.memory_space<vmem>>, vector<32x128xbf16>
    %52 = vector.extract_strided_slice %51 {offsets = [0, 0], sizes = [32, 32], strides = [1, 1]} : vector<32x128xbf16> to vector<32x32xbf16>
    %53 = arith.extf %52 : vector<32x32xbf16> to vector<32x32xf32>
    %54 = arith.addf %50, %53 : vector<32x32xf32>
    %55 = arith.truncf %54 : vector<32x32xf32> to vector<32x32xbf16>
    %c0_26 = arith.constant 0 : index
    %c0_27 = arith.constant 0 : index
    %56 = vector.load %arg12[%c0_26, %c0_27] : memref<32x32xbf16, #tpu.memory_space<vmem>>, vector<32x32xbf16>
    %cst_28 = arith.constant dense<0.000000e+00> : vector<32x32xf32>
    %57 = tpu.matmul %55, %56, %cst_28 {dimension_numbers = #tpu.dot_dimension_numbers<[1], [0], [0], [1], [0, 0, 1, 1], [], []>} : vector<32x32xbf16>, vector<32x32xbf16>, vector<32x32xf32> -> vector<32x32xf32>
    %c0_29 = arith.constant 0 : index
    %c0_30 = arith.constant 0 : index
    %58 = vector.load %arg13[%c0_29, %c0_30] : memref<1x32xf32, #tpu.memory_space<vmem>>, vector<1x32xf32>
    %59 = vector.broadcast %58 : vector<1x32xf32> to vector<32x32xf32>
    %60 = arith.addf %57, %59 : vector<32x32xf32>
    %61 = arith.negf %60 : vector<32x32xf32>
    %62 = math.exp %61 : vector<32x32xf32>
    %cst_31 = arith.constant 1.000000e+00 : f32
    %63 = vector.broadcast %cst_31 : f32 to vector<32x32xf32>
    %64 = arith.addf %63, %62 : vector<32x32xf32>
    %65 = arith.divf %63, %64 : vector<32x32xf32>
    %66 = arith.mulf %60, %65 : vector<32x32xf32>
    %67 = arith.truncf %66 : vector<32x32xf32> to vector<32x32xbf16>
    %c0_32 = arith.constant 0 : index
    %c0_33 = arith.constant 0 : index
    %68 = vector.load %arg14[%c0_32, %c0_33] : memref<32x32xbf16, #tpu.memory_space<vmem>>, vector<32x32xbf16>
    %cst_34 = arith.constant dense<0.000000e+00> : vector<32x32xf32>
    %69 = tpu.matmul %67, %68, %cst_34 {dimension_numbers = #tpu.dot_dimension_numbers<[1], [0], [0], [1], [0, 0, 1, 1], [], []>} : vector<32x32xbf16>, vector<32x32xbf16>, vector<32x32xf32> -> vector<32x32xf32>
    %c0_35 = arith.constant 0 : index
    %c0_36 = arith.constant 0 : index
    %70 = vector.load %arg15[%c0_35, %c0_36] : memref<1x32xf32, #tpu.memory_space<vmem>>, vector<1x32xf32>
    %71 = vector.broadcast %70 : vector<1x32xf32> to vector<32x32xf32>
    %72 = arith.addf %69, %71 : vector<32x32xf32>
    %73 = arith.negf %72 : vector<32x32xf32>
    %74 = math.exp %73 : vector<32x32xf32>
    %cst_37 = arith.constant 1.000000e+00 : f32
    %75 = vector.broadcast %cst_37 : f32 to vector<32x32xf32>
    %76 = arith.addf %75, %74 : vector<32x32xf32>
    %77 = arith.divf %75, %76 : vector<32x32xf32>
    %78 = arith.mulf %72, %77 : vector<32x32xf32>
    %79 = arith.addf %54, %78 : vector<32x32xf32>
    %80 = arith.truncf %79 : vector<32x32xf32> to vector<32x32xbf16>
    %c0_38 = arith.constant 0 : index
    %c0_39 = arith.constant 0 : index
    %81 = vector.load %arg16[%c0_38, %c0_39] : memref<32x32xbf16, #tpu.memory_space<vmem>>, vector<32x32xbf16>
    %cst_40 = arith.constant dense<0.000000e+00> : vector<32x32xf32>
    %82 = tpu.matmul %80, %81, %cst_40 {dimension_numbers = #tpu.dot_dimension_numbers<[1], [0], [0], [1], [0, 0, 1, 1], [], []>} : vector<32x32xbf16>, vector<32x32xbf16>, vector<32x32xf32> -> vector<32x32xf32>
    %c0_41 = arith.constant 0 : index
    %c0_42 = arith.constant 0 : index
    %83 = vector.load %arg17[%c0_41, %c0_42] : memref<1x32xf32, #tpu.memory_space<vmem>>, vector<1x32xf32>
    %84 = vector.broadcast %83 : vector<1x32xf32> to vector<32x32xf32>
    %85 = arith.addf %82, %84 : vector<32x32xf32>
    %86 = arith.negf %85 : vector<32x32xf32>
    %87 = math.exp %86 : vector<32x32xf32>
    %cst_43 = arith.constant 1.000000e+00 : f32
    %88 = vector.broadcast %cst_43 : f32 to vector<32x32xf32>
    %89 = arith.addf %88, %87 : vector<32x32xf32>
    %90 = arith.divf %88, %89 : vector<32x32xf32>
    %91 = arith.mulf %85, %90 : vector<32x32xf32>
    %92 = arith.truncf %91 : vector<32x32xf32> to vector<32x32xbf16>
    %c0_44 = arith.constant 0 : index
    %c0_45 = arith.constant 0 : index
    %93 = vector.load %arg18[%c0_44, %c0_45] : memref<32x32xbf16, #tpu.memory_space<vmem>>, vector<32x32xbf16>
    %cst_46 = arith.constant dense<0.000000e+00> : vector<32x32xf32>
    %94 = tpu.matmul %92, %93, %cst_46 {dimension_numbers = #tpu.dot_dimension_numbers<[1], [0], [0], [1], [0, 0, 1, 1], [], []>} : vector<32x32xbf16>, vector<32x32xbf16>, vector<32x32xf32> -> vector<32x32xf32>
    %c0_47 = arith.constant 0 : index
    %c0_48 = arith.constant 0 : index
    %95 = vector.load %arg19[%c0_47, %c0_48] : memref<1x32xf32, #tpu.memory_space<vmem>>, vector<1x32xf32>
    %96 = vector.broadcast %95 : vector<1x32xf32> to vector<32x32xf32>
    %97 = arith.addf %94, %96 : vector<32x32xf32>
    %98 = arith.negf %97 : vector<32x32xf32>
    %99 = math.exp %98 : vector<32x32xf32>
    %cst_49 = arith.constant 1.000000e+00 : f32
    %100 = vector.broadcast %cst_49 : f32 to vector<32x32xf32>
    %101 = arith.addf %100, %99 : vector<32x32xf32>
    %102 = arith.divf %100, %101 : vector<32x32xf32>
    %103 = arith.mulf %97, %102 : vector<32x32xf32>
    %104 = arith.addf %79, %103 : vector<32x32xf32>
    %c0_50 = arith.constant 0 : index
    %c0_51 = arith.constant 0 : index
    %105 = vector.load %arg4[%c0_50, %c0_51] : memref<32x6xf32, #tpu.memory_space<vmem>>, vector<32x6xf32>
    %106 = arith.truncf %105 : vector<32x6xf32> to vector<32x6xbf16>
    %c0_52 = arith.constant 0 : index
    %c0_53 = arith.constant 0 : index
    %107 = vector.load %arg20[%c0_52, %c0_53] : memref<6x32xbf16, #tpu.memory_space<vmem>>, vector<6x32xbf16>
    %cst_54 = arith.constant dense<0.000000e+00> : vector<32x32xf32>
    %108 = tpu.matmul %106, %107, %cst_54 {dimension_numbers = #tpu.dot_dimension_numbers<[1], [0], [0], [1], [0, 0, 1, 1], [], []>} : vector<32x6xbf16>, vector<6x32xbf16>, vector<32x32xf32> -> vector<32x32xf32>
    %109 = arith.mulf %108, %104 : vector<32x32xf32>
    %cst_55 = arith.constant 0.000000e+00 : f32
    %110 = vector.broadcast %cst_55 : f32 to vector<32x64xf32>
    %111 = tpu.concatenate %104, %109, %110 in 1 : vector<32x32xf32>, vector<32x32xf32>, vector<32x64xf32> -> vector<32x128xf32>
    %112 = arith.truncf %111 : vector<32x128xf32> to vector<32x128xbf16>
    %c0_56 = arith.constant 0 : index
    %c0_57 = arith.constant 0 : index
    %113 = vector.load %arg21[%c0_56, %c0_57] : memref<32x128xbf16, #tpu.memory_space<vmem>>, vector<32x128xbf16>
    tpu.vector_store %arg21[%c0_56, %c0_57], %112 {strides = array<i32>} : memref<32x128xbf16, #tpu.memory_space<vmem>>, vector<32x128xbf16>,
    return
  }
  func.func @transform_0(%arg0: i32) -> (i32, i32) {
    %c0_i32 = arith.constant 0 : i32
    %c0_i32_0 = arith.constant 0 : i32
    return %arg0, %c0_i32 : i32, i32
  }
  func.func @transform_1(%arg0: i32) -> (i32, i32) {
    %c0_i32 = arith.constant 0 : i32
    %c0_i32_0 = arith.constant 0 : i32
    return %arg0, %c0_i32 : i32, i32
  }
  func.func @transform_2(%arg0: i32) -> (i32, i32) {
    %c0_i32 = arith.constant 0 : i32
    %c0_i32_0 = arith.constant 0 : i32
    return %arg0, %c0_i32 : i32, i32
  }
  func.func @transform_3(%arg0: i32) -> (i32, i32) {
    %c0_i32 = arith.constant 0 : i32
    %c0_i32_0 = arith.constant 0 : i32
    return %arg0, %c0_i32 : i32, i32
  }
  func.func @transform_4(%arg0: i32) -> (i32, i32) {
    %c0_i32 = arith.constant 0 : i32
    %c0_i32_0 = arith.constant 0 : i32
    %c0_i32_1 = arith.constant 0 : i32
    return %c0_i32, %c0_i32_0 : i32, i32
  }
  func.func @transform_5(%arg0: i32) -> (i32, i32) {
    %c0_i32 = arith.constant 0 : i32
    %c0_i32_0 = arith.constant 0 : i32
    %c0_i32_1 = arith.constant 0 : i32
    return %c0_i32, %c0_i32_0 : i32, i32
  }
  func.func @transform_6(%arg0: i32) -> (i32, i32) {
    %c0_i32 = arith.constant 0 : i32
    %c0_i32_0 = arith.constant 0 : i32
    %c0_i32_1 = arith.constant 0 : i32
    return %c0_i32, %c0_i32_0 : i32, i32
  }
  func.func @transform_7(%arg0: i32) -> (i32, i32) {
    %c0_i32 = arith.constant 0 : i32
    %c0_i32_0 = arith.constant 0 : i32
    %c0_i32_1 = arith.constant 0 : i32
    return %c0_i32, %c0_i32_0 : i32, i32
  }
  func.func @transform_8(%arg0: i32) -> (i32, i32) {
    %c0_i32 = arith.constant 0 : i32
    %c0_i32_0 = arith.constant 0 : i32
    %c0_i32_1 = arith.constant 0 : i32
    return %c0_i32, %c0_i32_0 : i32, i32
  }
  func.func @transform_9(%arg0: i32) -> (i32, i32) {
    %c0_i32 = arith.constant 0 : i32
    %c0_i32_0 = arith.constant 0 : i32
    %c0_i32_1 = arith.constant 0 : i32
    return %c0_i32, %c0_i32_0 : i32, i32
  }
  func.func @transform_10(%arg0: i32) -> (i32, i32) {
    %c0_i32 = arith.constant 0 : i32
    %c0_i32_0 = arith.constant 0 : i32
    %c0_i32_1 = arith.constant 0 : i32
    return %c0_i32, %c0_i32_0 : i32, i32
  }
  func.func @transform_11(%arg0: i32) -> (i32, i32) {
    %c0_i32 = arith.constant 0 : i32
    %c0_i32_0 = arith.constant 0 : i32
    %c0_i32_1 = arith.constant 0 : i32
    return %c0_i32, %c0_i32_0 : i32, i32
  }
  func.func @transform_12(%arg0: i32) -> (i32, i32) {
    %c0_i32 = arith.constant 0 : i32
    %c0_i32_0 = arith.constant 0 : i32
    %c0_i32_1 = arith.constant 0 : i32
    return %c0_i32, %c0_i32_0 : i32, i32
  }
  func.func @transform_13(%arg0: i32) -> (i32, i32) {
    %c0_i32 = arith.constant 0 : i32
    %c0_i32_0 = arith.constant 0 : i32
    %c0_i32_1 = arith.constant 0 : i32
    return %c0_i32, %c0_i32_0 : i32, i32
  }
  func.func @transform_14(%arg0: i32) -> (i32, i32) {
    %c0_i32 = arith.constant 0 : i32
    %c0_i32_0 = arith.constant 0 : i32
    %c0_i32_1 = arith.constant 0 : i32
    return %c0_i32, %c0_i32_0 : i32, i32
  }
  func.func @transform_15(%arg0: i32) -> (i32, i32) {
    %c0_i32 = arith.constant 0 : i32
    %c0_i32_0 = arith.constant 0 : i32
    %c0_i32_1 = arith.constant 0 : i32
    return %c0_i32, %c0_i32_0 : i32, i32
  }
  func.func @transform_16(%arg0: i32) -> (i32, i32) {
    %c0_i32 = arith.constant 0 : i32
    %c0_i32_0 = arith.constant 0 : i32
    %c0_i32_1 = arith.constant 0 : i32
    return %c0_i32, %c0_i32_0 : i32, i32
  }
  func.func @transform_17(%arg0: i32) -> (i32, i32) {
    %c0_i32 = arith.constant 0 : i32
    %c0_i32_0 = arith.constant 0 : i32
    %c0_i32_1 = arith.constant 0 : i32
    return %c0_i32, %c0_i32_0 : i32, i32
  }
  func.func @transform_18(%arg0: i32) -> (i32, i32) {
    %c0_i32 = arith.constant 0 : i32
    %c0_i32_0 = arith.constant 0 : i32
    %c0_i32_1 = arith.constant 0 : i32
    return %c0_i32, %c0_i32_0 : i32, i32
  }
  func.func @transform_19(%arg0: i32) -> (i32, i32) {
    %c0_i32 = arith.constant 0 : i32
    %c0_i32_0 = arith.constant 0 : i32
    %c0_i32_1 = arith.constant 0 : i32
    return %c0_i32, %c0_i32_0 : i32, i32
  }
  func.func @transform_20(%arg0: i32) -> (i32, i32) {
    %c0_i32 = arith.constant 0 : i32
    %c0_i32_0 = arith.constant 0 : i32
    return %arg0, %c0_i32 : i32, i32
  }
}

module attributes {stable_mosaic.version = 11 : i64} {
  func.func @kern(%arg0: i32, %arg1: memref<16x32xf32, #tpu.memory_space<vmem>>, %arg2: memref<32x32xbf16, #tpu.memory_space<vmem>>, %arg3: memref<1x32xf32, #tpu.memory_space<vmem>>, %arg4: memref<32x32xbf16, #tpu.memory_space<vmem>>, %arg5: memref<1x32xf32, #tpu.memory_space<vmem>>, %arg6: memref<32x32xbf16, #tpu.memory_space<vmem>>, %arg7: memref<1x32xf32, #tpu.memory_space<vmem>>, %arg8: memref<32x32xbf16, #tpu.memory_space<vmem>>, %arg9: memref<1x32xf32, #tpu.memory_space<vmem>>, %arg10: memref<32x128xbf16, #tpu.memory_space<vmem>>, %arg11: memref<16x128xf32, #tpu.memory_space<vmem>>) attributes {dimension_semantics = [#tpu.dimension_semantics<parallel>], iteration_bounds = array<i64: 1>, scalar_prefetch = 0 : i64, scratch_operands = 0 : i64, tpu.core_type = #tpu.core_type<tc>, window_params = [{transform_indices = @transform_0, window_bounds = array<i64: 16, 32>}, {pipeline_mode = #tpu.pipeline_mode<synchronous>, transform_indices = @transform_1, window_bounds = array<i64: 32, 32>}, {pipeline_mode = #tpu.pipeline_mode<synchronous>, transform_indices = @transform_2, window_bounds = array<i64: 1, 32>}, {pipeline_mode = #tpu.pipeline_mode<synchronous>, transform_indices = @transform_3, window_bounds = array<i64: 32, 32>}, {pipeline_mode = #tpu.pipeline_mode<synchronous>, transform_indices = @transform_4, window_bounds = array<i64: 1, 32>}, {pipeline_mode = #tpu.pipeline_mode<synchronous>, transform_indices = @transform_5, window_bounds = array<i64: 32, 32>}, {pipeline_mode = #tpu.pipeline_mode<synchronous>, transform_indices = @transform_6, window_bounds = array<i64: 1, 32>}, {pipeline_mode = #tpu.pipeline_mode<synchronous>, transform_indices = @transform_7, window_bounds = array<i64: 32, 32>}, {pipeline_mode = #tpu.pipeline_mode<synchronous>, transform_indices = @transform_8, window_bounds = array<i64: 1, 32>}, {pipeline_mode = #tpu.pipeline_mode<synchronous>, transform_indices = @transform_9, window_bounds = array<i64: 32, 128>}, {transform_indices = @transform_10, window_bounds = array<i64: 16, 128>}]} {
    %c0 = arith.constant 0 : index
    %c0_0 = arith.constant 0 : index
    %0 = vector.load %arg1[%c0, %c0_0] : memref<16x32xf32, #tpu.memory_space<vmem>>, vector<16x32xf32>
    %1 = arith.truncf %0 : vector<16x32xf32> to vector<16x32xbf16>
    %c0_1 = arith.constant 0 : index
    %c0_2 = arith.constant 0 : index
    %2 = vector.load %arg2[%c0_1, %c0_2] : memref<32x32xbf16, #tpu.memory_space<vmem>>, vector<32x32xbf16>
    %cst = arith.constant dense<0.000000e+00> : vector<16x32xf32>
    %3 = tpu.matmul %1, %2, %cst {dimension_numbers = #tpu.dot_dimension_numbers<[1], [0], [0], [1], [0, 0, 1, 1], [], []>} : vector<16x32xbf16>, vector<32x32xbf16>, vector<16x32xf32> -> vector<16x32xf32>
    %c0_3 = arith.constant 0 : index
    %c0_4 = arith.constant 0 : index
    %4 = vector.load %arg3[%c0_3, %c0_4] : memref<1x32xf32, #tpu.memory_space<vmem>>, vector<1x32xf32>
    %5 = vector.broadcast %4 : vector<1x32xf32> to vector<16x32xf32>
    %6 = arith.addf %3, %5 : vector<16x32xf32>
    %7 = arith.truncf %6 : vector<16x32xf32> to vector<16x32xbf16>
    %c0_5 = arith.constant 0 : index
    %c0_6 = arith.constant 0 : index
    %8 = vector.load %arg4[%c0_5, %c0_6] : memref<32x32xbf16, #tpu.memory_space<vmem>>, vector<32x32xbf16>
    %cst_7 = arith.constant dense<0.000000e+00> : vector<16x32xf32>
    %9 = tpu.matmul %7, %8, %cst_7 {dimension_numbers = #tpu.dot_dimension_numbers<[1], [0], [0], [1], [0, 0, 1, 1], [], []>} : vector<16x32xbf16>, vector<32x32xbf16>, vector<16x32xf32> -> vector<16x32xf32>
    %c0_8 = arith.constant 0 : index
    %c0_9 = arith.constant 0 : index
    %10 = vector.load %arg5[%c0_8, %c0_9] : memref<1x32xf32, #tpu.memory_space<vmem>>, vector<1x32xf32>
    %11 = vector.broadcast %10 : vector<1x32xf32> to vector<16x32xf32>
    %12 = arith.addf %9, %11 : vector<16x32xf32>
    %13 = arith.negf %12 : vector<16x32xf32>
    %14 = math.exp %13 : vector<16x32xf32>
    %cst_10 = arith.constant 1.000000e+00 : f32
    %15 = vector.broadcast %cst_10 : f32 to vector<16x32xf32>
    %16 = arith.addf %15, %14 : vector<16x32xf32>
    %17 = arith.divf %15, %16 : vector<16x32xf32>
    %18 = arith.mulf %12, %17 : vector<16x32xf32>
    %19 = arith.truncf %18 : vector<16x32xf32> to vector<16x32xbf16>
    %c0_11 = arith.constant 0 : index
    %c0_12 = arith.constant 0 : index
    %20 = vector.load %arg6[%c0_11, %c0_12] : memref<32x32xbf16, #tpu.memory_space<vmem>>, vector<32x32xbf16>
    %cst_13 = arith.constant dense<0.000000e+00> : vector<16x32xf32>
    %21 = tpu.matmul %19, %20, %cst_13 {dimension_numbers = #tpu.dot_dimension_numbers<[1], [0], [0], [1], [0, 0, 1, 1], [], []>} : vector<16x32xbf16>, vector<32x32xbf16>, vector<16x32xf32> -> vector<16x32xf32>
    %c0_14 = arith.constant 0 : index
    %c0_15 = arith.constant 0 : index
    %22 = vector.load %arg7[%c0_14, %c0_15] : memref<1x32xf32, #tpu.memory_space<vmem>>, vector<1x32xf32>
    %23 = vector.broadcast %22 : vector<1x32xf32> to vector<16x32xf32>
    %24 = arith.addf %21, %23 : vector<16x32xf32>
    %25 = arith.negf %24 : vector<16x32xf32>
    %26 = math.exp %25 : vector<16x32xf32>
    %cst_16 = arith.constant 1.000000e+00 : f32
    %27 = vector.broadcast %cst_16 : f32 to vector<16x32xf32>
    %28 = arith.addf %27, %26 : vector<16x32xf32>
    %29 = arith.divf %27, %28 : vector<16x32xf32>
    %30 = arith.mulf %24, %29 : vector<16x32xf32>
    %31 = arith.truncf %30 : vector<16x32xf32> to vector<16x32xbf16>
    %c0_17 = arith.constant 0 : index
    %c0_18 = arith.constant 0 : index
    %32 = vector.load %arg8[%c0_17, %c0_18] : memref<32x32xbf16, #tpu.memory_space<vmem>>, vector<32x32xbf16>
    %cst_19 = arith.constant dense<0.000000e+00> : vector<16x32xf32>
    %33 = tpu.matmul %31, %32, %cst_19 {dimension_numbers = #tpu.dot_dimension_numbers<[1], [0], [0], [1], [0, 0, 1, 1], [], []>} : vector<16x32xbf16>, vector<32x32xbf16>, vector<16x32xf32> -> vector<16x32xf32>
    %c0_20 = arith.constant 0 : index
    %c0_21 = arith.constant 0 : index
    %34 = vector.load %arg9[%c0_20, %c0_21] : memref<1x32xf32, #tpu.memory_space<vmem>>, vector<1x32xf32>
    %35 = vector.broadcast %34 : vector<1x32xf32> to vector<16x32xf32>
    %36 = arith.addf %33, %35 : vector<16x32xf32>
    %37 = arith.negf %36 : vector<16x32xf32>
    %38 = math.exp %37 : vector<16x32xf32>
    %cst_22 = arith.constant 1.000000e+00 : f32
    %39 = vector.broadcast %cst_22 : f32 to vector<16x32xf32>
    %40 = arith.addf %39, %38 : vector<16x32xf32>
    %41 = arith.divf %39, %40 : vector<16x32xf32>
    %42 = arith.mulf %36, %41 : vector<16x32xf32>
    %43 = arith.truncf %42 : vector<16x32xf32> to vector<16x32xbf16>
    %c0_23 = arith.constant 0 : index
    %c0_24 = arith.constant 0 : index
    %44 = vector.load %arg10[%c0_23, %c0_24] : memref<32x128xbf16, #tpu.memory_space<vmem>>, vector<32x128xbf16>
    %cst_25 = arith.constant dense<0.000000e+00> : vector<16x128xf32>
    %45 = tpu.matmul %43, %44, %cst_25 {dimension_numbers = #tpu.dot_dimension_numbers<[1], [0], [0], [1], [0, 0, 1, 1], [], []>} : vector<16x32xbf16>, vector<32x128xbf16>, vector<16x128xf32> -> vector<16x128xf32>
    %c0_26 = arith.constant 0 : index
    %c0_27 = arith.constant 0 : index
    %46 = vector.load %arg11[%c0_26, %c0_27] : memref<16x128xf32, #tpu.memory_space<vmem>>, vector<16x128xf32>
    tpu.vector_store %arg11[%c0_26, %c0_27], %45 {strides = array<i32>} : memref<16x128xf32, #tpu.memory_space<vmem>>, vector<16x128xf32>,
    return
  }
  func.func @transform_0(%arg0: i32) -> (i32, i32) {
    %c0_i32 = arith.constant 0 : i32
    %c0_i32_0 = arith.constant 0 : i32
    return %arg0, %c0_i32 : i32, i32
  }
  func.func @transform_1(%arg0: i32) -> (i32, i32) {
    %c0_i32 = arith.constant 0 : i32
    %c0_i32_0 = arith.constant 0 : i32
    %c0_i32_1 = arith.constant 0 : i32
    return %c0_i32, %c0_i32_0 : i32, i32
  }
  func.func @transform_2(%arg0: i32) -> (i32, i32) {
    %c0_i32 = arith.constant 0 : i32
    %c0_i32_0 = arith.constant 0 : i32
    %c0_i32_1 = arith.constant 0 : i32
    return %c0_i32, %c0_i32_0 : i32, i32
  }
  func.func @transform_3(%arg0: i32) -> (i32, i32) {
    %c0_i32 = arith.constant 0 : i32
    %c0_i32_0 = arith.constant 0 : i32
    %c0_i32_1 = arith.constant 0 : i32
    return %c0_i32, %c0_i32_0 : i32, i32
  }
  func.func @transform_4(%arg0: i32) -> (i32, i32) {
    %c0_i32 = arith.constant 0 : i32
    %c0_i32_0 = arith.constant 0 : i32
    %c0_i32_1 = arith.constant 0 : i32
    return %c0_i32, %c0_i32_0 : i32, i32
  }
  func.func @transform_5(%arg0: i32) -> (i32, i32) {
    %c0_i32 = arith.constant 0 : i32
    %c0_i32_0 = arith.constant 0 : i32
    %c0_i32_1 = arith.constant 0 : i32
    return %c0_i32, %c0_i32_0 : i32, i32
  }
  func.func @transform_6(%arg0: i32) -> (i32, i32) {
    %c0_i32 = arith.constant 0 : i32
    %c0_i32_0 = arith.constant 0 : i32
    %c0_i32_1 = arith.constant 0 : i32
    return %c0_i32, %c0_i32_0 : i32, i32
  }
  func.func @transform_7(%arg0: i32) -> (i32, i32) {
    %c0_i32 = arith.constant 0 : i32
    %c0_i32_0 = arith.constant 0 : i32
    %c0_i32_1 = arith.constant 0 : i32
    return %c0_i32, %c0_i32_0 : i32, i32
  }
  func.func @transform_8(%arg0: i32) -> (i32, i32) {
    %c0_i32 = arith.constant 0 : i32
    %c0_i32_0 = arith.constant 0 : i32
    %c0_i32_1 = arith.constant 0 : i32
    return %c0_i32, %c0_i32_0 : i32, i32
  }
  func.func @transform_9(%arg0: i32) -> (i32, i32) {
    %c0_i32 = arith.constant 0 : i32
    %c0_i32_0 = arith.constant 0 : i32
    %c0_i32_1 = arith.constant 0 : i32
    return %c0_i32, %c0_i32_0 : i32, i32
  }
  func.func @transform_10(%arg0: i32) -> (i32, i32) {
    %c0_i32 = arith.constant 0 : i32
    %c0_i32_0 = arith.constant 0 : i32
    return %arg0, %c0_i32 : i32, i32
  }
}

</mosaic_0001>

<bundles_post_ra>
// kernel: _lambda_.13
= control target key start
LH: loop header
LB: loop body
LE: loop exit
PB: predicated region body
PF: predicated region fallthrough
CT: control target
= control target key end

     0   :  { %s522_s12 = smov 0   ;;  %s571_s0 = inlined_call_operand.vmem [shape: bf16[128,16], index: 0, kind: input, shape index: {}]   ;;  %s572_s1 = inlined_call_operand.vmem [shape: f32[128,42], index: 1, kind: input, shape index: {}]   ;;  %s573_s2 = inlined_call_operand.vmem [shape: bf16[42,16], index: 2, kind: input, shape index: {}]   ;;  %s574_s3 = inlined_call_operand.vmem [shape: f32[128,16], index: 3, kind: output, shape index: {}]  }
   0x1 LB: > { %s415_s13 = sadd.s32 4294967295, %s500_s12   ;;  %p419_p0 = scmp.ge.s32.totalorder %s500_s12, 1  ;;  %s500_s12 = sphi %s522_s12, %s13_s12  }
   0x2   : > { %p149_p1 = scmp.lt.s32.totalorder %s500_s12, 3 }
   0x4   : > { %p150_p2 = pnand %p419_p0, %p149_p1 }
   0x5   : > { %v491_v0 = vld [vmem:[%s573_s2] sm:$0xff] (!%p150_p2)   ;;  %v492_v1 = vld [vmem:[%s573_s2 + $0x8] sm:$0xff] (!%p150_p2)   ;;  %s420_s18 = sshll.u32 (!%p150_p2), %s415_s13, 3  ;;  %v493_v2 = vld [vmem:[%s573_s2 + $0x10] sm:$0x1f] (!%p150_p2)   ;;  %vm245_vm0 = vcmask (!%p150_p2), 1044480  }
   0x6   : > { %153 = sbr.rel (%p150_p2) target bundleno = 239 (0xef), region = 32  ;;  %461 = vmatprep.subr.bf16.mxu0 (!%p150_p2), %v491_v0  ;;  %475 = vmatprep.subr.bf16.mxu1 (!%p150_p2), %v491_v0  ;;  %p179_p3 = scmp.lt.s32.totalorder (!%p150_p2), %s420_s18, 15  ;;  %v247_v3 = vsel (!%p150_p2), %vm245_vm0, %v493_v2, 0  ;;  %vm232_vm1 = vcmask (!%p150_p2), 343040   ;;  %vm338_vm2 = vcmask (!%p150_p2), 130048  }
   0x7   : > { %462 = vmatpush3.bf16.msra.mxu0 (!%p150_p2), %v491_v0  ;;  %478 = vmatpush3.bf16.msra.mxu1 (!%p150_p2), %v491_v0 }
   0x8   : > { %463 = vmatprep.subr.bf16.mxu0 (!%p150_p2), %v492_v1  ;;  %476 = vmatprep.subr.bf16.mxu1 (!%p150_p2), %v492_v1 }
   0xb   : > { %464 = vmatpush3.bf16.msra.mxu0 (!%p150_p2), %v492_v1  ;;  %479 = vmatpush3.bf16.msra.mxu1 (!%p150_p2), %v492_v1 }
   0xc   : > { %481 = vmatprep.subr.msk.bf16.mxu0 (!%p150_p2), %vm245_vm0, %v493_v2  ;;  %482 = vmatprep.subr.msk.bf16.mxu1 (!%p150_p2), %vm245_vm0, %v493_v2 }
   0xd   : > { %s576_s18 = smov (!%p179_p3, %s420_s18), 15 }
   0xe   : > { %s423_s21 = sshll.u32 %s576_s18, 3  ;;  %s421_s25 = sshll.u32 %s576_s18, 2 }
   0xf   : > { %s188_s24 = scalar_lea.vmem %s572_s1, %s423_s21  ;;  %466 = vmatpush3.bf16.msra.mxu0 %v247_v3  ;;  %480 = vmatpush3.bf16.msra.mxu1 %v247_v3  ;;  %s182_s28 = scalar_lea.vmem %s571_s0, %s421_s25 }
  0x10   : > { %v197_v4 = vld [vmem:[%s188_s24] sm:$0xff]  ;;  %v198_v5 = vld [vmem:[%s188_s24 + $0x8] sm:$0xff]  ;;  %v199_v9 = vld [vmem:[%s188_s24 + $0x10] sm:$0xff]  ;;  %s194_s4 = scalar_lea.vmem %s574_s3, %s423_s21 }
  0x11   : > { %v201_v6 = vld [vmem:[%s188_s24 + $0x20] sm:$0xff]  ;;  %v205_v7 = vpack.c.bf16 %v198_v5, %v197_v4  ;;  %v202_v8 = vld [vmem:[%s188_s24 + $0x28] sm:$0xff]  ;;  %v200_v10 = vld [vmem:[%s188_s24 + $0x18] sm:$0xff] }
  0x12   : > { %v207_v11 = vpack.c.bf16 %v202_v8, %v201_v6  ;;  %v206_v12 = vpack.c.bf16 %v200_v10, %v199_v9  ;;  %v203_v13 = vld [vmem:[%s188_s24 + $0x30] sm:$0xff]  ;;  %v204_v14 = vld [vmem:[%s188_s24 + $0x38] sm:$0xff]  ;;  %v451_v16 = vld [vmem:[%s182_s28 + $0x8] sm:$0xff]  }
  0x13   : > { %467 = vmatprep.mubr.msk.bf16.mxu0 %vm232_vm1, %v205_v7  ;;  %v208_v15 = vpack.c.bf16 %v204_v14, %v203_v13  ;;  %v453_v17 = vld [vmem:[%s182_s28 + $0x18] sm:$0xff]   ;;  %v436_v18 = vld [vmem:[%s182_s28] sm:$0xff]   ;;  %v452_v19 = vld [vmem:[%s182_s28 + $0x10] sm:$0xff]   ;;  %v441_v20 = vunpack.c.l.bf16 %v451_v16  ;;  %v442_v24 = vunpack.c.h.bf16 %v451_v16 }
  0x14   : > { %471 = vmatprep.mubr.msk.bf16.mxu1 %vm232_vm1, %v207_v11  ;;  %468 = vmatmul.mubr.msk.bf16.vlgmr.msra.gmra.mrb[0].mxu0 %vm232_vm1, %v206_v12  ;;  %v449_v21 = vunpack.c.l.bf16 %v453_v17  ;;  %v437_v22 = vunpack.c.l.bf16 %v436_v18  ;;  %v445_v23 = vunpack.c.l.bf16 %v452_v19  ;;  %v450_v25 = vunpack.c.h.bf16 %v453_v17 }
  0x15   : > { %472 = vmatmul.mubr.msk.bf16.vlgmr.msra.gmra.mrb[0].mxu1 %vm232_vm1, %v208_v15  ;;  %v438_v28 = vunpack.c.h.bf16 %v436_v18  ;;  %v446_v29 = vunpack.c.h.bf16 %v452_v19 }
  0xe7   : > { %v469_v26 = vpop.f32.mrb[0].mxu0 }
  0xe8   : > { %v473_v27 = vpop.f32.mrb[0].mxu1  ;;  %v332_v30 = vmul.f32 %v469_v26, %v441_v20  ;;  %v283_v32 = vpop.f32.mrb[1].mxu0 }
  0xe9   : > { %v336_v31 = vmul.f32 %v473_v27, %v449_v21  ;;  %v299_v33 = vpop.f32.mrb[1].mxu1  ;;  %v330_v34 = vmul.f32 %v437_v22, %v283_v32  ;;  %v470_v36 = vpop.f32.mrb[2].mxu0 }
  0xea   : > { %v334_v35 = vmul.f32 %v445_v23, %v299_v33  ;;  %v474_v37 = vpop.f32.mrb[2].mxu1  ;;  %341 = vst.msk [vmem:[%s194_s4 + $0x10] sm:$0xff] %vm338_vm2, %v332_v30  ;;  %v333_v38 = vmul.f32 %v470_v36, %v442_v24  ;;  %v286_v40 = vpop.f32.mrb[3].mxu0 }
  0xeb   : > { %345 = vst.msk [vmem:[%s194_s4 + $0x30] sm:$0xff] %vm338_vm2, %v336_v31  ;;  %v337_v39 = vmul.f32 %v474_v37, %v450_v25  ;;  %v302_v41 = vpop.f32.mrb[3].mxu1  ;;  %339 = vst.msk [vmem:[%s194_s4] sm:$0xff] %vm338_vm2, %v330_v34  ;;  %v331_v42 = vmul.f32 %v438_v28, %v286_v40 }
  0xec   : > { %343 = vst.msk [vmem:[%s194_s4 + $0x20] sm:$0xff] %vm338_vm2, %v334_v35  ;;  %v335_v43 = vmul.f32 %v446_v29, %v302_v41  ;;  %342 = vst.msk [vmem:[%s194_s4 + $0x18] sm:$0xff] %vm338_vm2, %v333_v38 }
  0xed   : > { %346 = vst.msk [vmem:[%s194_s4 + $0x38] sm:$0xff] %vm338_vm2, %v337_v39  ;;  %340 = vst.msk [vmem:[%s194_s4 + $0x8] sm:$0xff] %vm338_vm2, %v331_v42 }
  0xee   : > { %344 = vst.msk [vmem:[%s194_s4 + $0x28] sm:$0xff] %vm338_vm2, %v335_v43 }
  0xef PF: > { %s13_s12 = sadd.s32 1, %s500_s12  }
  0xf0   : > { %p10_p4 = scmp.ge.s32.totalorder %s13_s12, 4  }
  0xf2   :  { %12 = sbr.rel (!%p10_p4) target bundleno = 1 (0x1), region = 65 }

// kernel: _lambda_.12
= control target key start
LH: loop header
LB: loop body
LE: loop exit
PB: predicated region body
PF: predicated region fallthrough
CT: control target
= control target key end

     0   :  { %s896_s21 = smov 0   ;;  %s968_s0 = inlined_call_operand.vmem [shape: bf16[64,128], index: 0, kind: input, shape index: {}]   ;;  %s969_s1 = inlined_call_operand.vmem [shape: f32[64,6], index: 1, kind: input, shape index: {}]   ;;  %s970_s2 = inlined_call_operand.vmem [shape: bf16[32,64], index: 2, kind: input, shape index: {}]   ;;  %s971_s3 = inlined_call_operand.vmem [shape: f32[1,64], index: 3, kind: input, shape index: {}]   ;;  %s972_s4 = inlined_call_operand.vmem [shape: bf16[6,32], index: 4, kind: input, shape index: {}]   ;;  %s973_s5 = inlined_call_operand.vmem [shape: bf16[32,16], index: 5, kind: input, shape index: {}]   ;;  %s974_s6 = inlined_call_operand.vmem [shape: bf16[64,128], index: 6, kind: output, shape index: {}]  }
   0x1 LB: > { %s706_s22 = sadd.s32 4294967295, %s857_s21   ;;  %p710_p0 = scmp.ge.s32.totalorder %s857_s21, 1  ;;  %s857_s21 = sphi %s896_s21, %s16_s21  }
   0x2   : > { %p224_p1 = scmp.lt.s32.totalorder %s857_s21, 3 }
   0x4   : > { %p225_p2 = pnand %p710_p0, %p224_p1 }
   0x5   : > { %v405_v0 = vld [vmem:[%s972_s4] sm:$0x7] (!%p225_p2)  ;;  %vm413_vm0 = vcmask (!%p225_p2), 1042432   ;;  %s711_s25 = sshll.u32 (!%p225_p2), %s706_s22, 2  ;;  %v814_v3 = vld [vmem:[%s970_s2 + $0x8] sm:$0xff] (!%p225_p2)   ;;  %vm406_vm1 = vcmask (!%p225_p2), 48128  }
   0x6   : > { %228 = sbr.rel (%p225_p2) target bundleno = 839 (0x347), region = 44  ;;  %v813_v1 = vld [vmem:[%s970_s2] sm:$0xff] (!%p225_p2)   ;;  %792 = vmatprep.subr.msk.bf16.mxu1 (!%p225_p2), %vm413_vm0, %v405_v0  ;;  %v415_v2 = vsel (!%p225_p2), %vm413_vm0, %v405_v0, 0  ;;  %p260_p3 = scmp.lt.s32.totalorder (!%p225_p2), %s711_s25, 7  ;;  %vm315_vm2 = vcmask (!%p225_p2), 261120   ;;  %v818_v13 = vld [vmem:[%s973_s5 + $0x8] sm:$0xff] (!%p225_p2)  }
   0x7   : > { %779 = vmatpush3.bf16.msra.mxu1 (!%p225_p2), %v415_v2  ;;  %770 = vmatprep.subr.bf16.mxu0 (!%p225_p2), %v813_v1  ;;  %v817_v12 = vld [vmem:[%s973_s5] sm:$0xff] (!%p225_p2)   ;;  %s859_s18 = smov (!%p225_p2), 32   ;;  %s860_s22 = smov (!%p225_p2), 96   ;;  %vm613_vm3 = vcmask (!%p225_p2), 392192  }
   0x8   : > { %771 = vmatpush3.bf16.msra.mxu0 (!%p225_p2), %v813_v1  ;;  %784 = vmatprep.subr.bf16.mxu1 (!%p225_p2), %v817_v12  ;;  %v717_v22 = vld [vmem:[%s971_s3] ss:$0 sm:$0xff] (!%p225_p2) }
   0x9   : > { %772 = vmatprep.subr.bf16.mxu0 (!%p225_p2), %v814_v3 }
   0xc   : > { %773 = vmatpush3.bf16.msra.mxu0 (!%p225_p2), %v814_v3 }
   0xd   : > { %s976_s25 = smov (!%p260_p3, %s711_s25), 7 }
   0xe   : > { %s714_s30 = sshll.u32 %s976_s25, 3  ;;  %s712_s7 = sshll.u32 %s976_s25, 2 }
   0xf   : > { %s269_s10 = scalar_lea.vmem %s969_s1, %s714_s30  ;;  %s263_s13 = scalar_lea.vmem %s968_s0, %s712_s7 }
  0x10   : > { %v399_v4 = vld [vmem:[%s269_s10] sm:$0xff]  ;;  %v400_v5 = vld [vmem:[%s269_s10 + $0x8] sm:$0xff]  ;;  %v401_v6 = vld [vmem:[%s269_s10 + $0x10] sm:$0xff]  ;;  %s275_s26 = scalar_lea.vmem %s974_s6, %s712_s7 }
  0x11   : > { %v403_v7 = vpack.c.bf16 %v400_v5, %v399_v4  ;;  %v402_v8 = vld [vmem:[%s269_s10 + $0x18] sm:$0xff]  ;;  %v815_v10 = vld [vmem:[%s263_s13] sm:$0xff]   ;;  %v816_v11 = vld [vmem:[%s263_s13 + $0x8] sm:$0xff]  }
  0x12   : > { %v404_v9 = vpack.c.bf16 %v402_v8, %v401_v6  ;;  %774 = vmatprep.mubr.msk.bf16.mxu0 %vm315_vm2, %v815_v10 }
  0x13   : > { %780 = vmatprep.mubr.msk.bf16.mxu1 %vm406_vm1, %v403_v7  ;;  %775 = vmatmul.mubr.msk.bf16.vlgmr.msra.gmra.mrb[0].mxu0 %vm315_vm2, %v816_v11 }
  0x14   : > { %781 = vmatmul.mubr.msk.bf16.vlgmr.msra.gmra.mrb[0].mxu1 %vm406_vm1, %v404_v9 }
  0x15   : > { %785 = vmatpush3.bf16.msra.mxu1 %v817_v12 }
  0x16   : > { %786 = vmatprep.subr.bf16.mxu1 %v818_v13 }
  0x19   : > { %787 = vmatpush3.bf16.msra.mxu1 %v818_v13 }
  0xe6   : > { %v776_v16 = vpop.f32.mrb[0].mxu0 }
  0xe7   : > { %v782_v14 = vpop.f32.mrb[0].mxu1  ;;  %v356_v18 = vpop.f32.mrb[1].mxu0  ;;  %v365_v23 = vadd.f32 %v776_v16, %v717_v22 }
  0xe8   : > { %474 = vrot.lane.b32.xlu1 %v782_v14, %s859_s18  ;;  %v451_v15 = vpop.f32.mrb[1].mxu1  ;;  %v777_v20 = vpop.f32.mrb[2].mxu0  ;;  %v357_v24 = vadd.f32 %v717_v22, %v356_v18 }
  0xe9   : > { %470 = vrot.lane.b32.xlu0 %v451_v15, %s859_s18  ;;  %v783_v17 = vpop.f32.mrb[2].mxu1  ;;  %v359_v21 = vpop.f32.mrb[3].mxu0  ;;  %v368_v25 = vadd.f32 %v777_v20, %v717_v22  ;;  %v726_v27 = vmul.f32 -1.442695, %v365_v23 }
  0xea   : > { %v454_v19 = vpop.f32.mrb[3].mxu1  ;;  %v360_v26 = vadd.f32 %v717_v22, %v359_v21  ;;  %v724_v28 = vmul.f32 -1.442695, %v357_v24 }
  0xeb   : > { %v727_v29 = vmul.f32 -1.442695, %v368_v25  ;;  %819 = vpow2.f32 %v726_v27 }
  0xec   : > { %476 = vrot.lane.b32.xlu1 %v783_v17, %s859_s18  ;;  %v725_v30 = vmul.f32 -1.442695, %v360_v26  ;;  %821 = vpow2.f32 %v724_v28 }
  0xed   : > { %472 = vrot.lane.b32.xlu0 %v454_v19, %s859_s18  ;;  %823 = vpow2.f32 %v727_v29 }
  0xee   : > { %825 = vpow2.f32 %v725_v30 }
  0xf5   : > { %v820_v31 = vpop.eup %819 }
  0xf6   : > { %v822_v32 = vpop.eup %821  ;;  %v385_v35 = vadd.f32 1.0, %v820_v31 }
  0xf7   : > { %v824_v33 = vpop.eup %823  ;;  %v383_v36 = vadd.f32 1.0, %v822_v32 }
  0xf8   : > { %v826_v34 = vpop.eup %825  ;;  %v386_v37 = vadd.f32 1.0, %v824_v33  ;;  %827 = vrcp.f32 %v385_v35 }
  0xf9   : > { %v384_v38 = vadd.f32 1.0, %v826_v34  ;;  %829 = vrcp.f32 %v383_v36 }
  0xfa   : > { %831 = vrcp.f32 %v386_v37 }
  0xfb   : > { %833 = vrcp.f32 %v384_v38 }
 0x102   : > { %v828_v39 = vpop.eup %827 }
 0x103   : > { %v830_v40 = vpop.eup %829  ;;  %v940_v45 = vmul.f32 %v828_v39, %v365_v23 }
 0x104   : > { %v832_v41 = vpop.eup %831  ;;  %v942_v47 = vmul.f32 %v830_v40, %v357_v24 }
 0x105   : > { %v834_v43 = vpop.eup %833  ;;  %v398_v46 = vmul.f32 %v832_v41, %v368_v25 }
 0x106   : > { %v944_v49 = vmul.f32 %v834_v43, %v360_v26 }
 0x15a   : > { %v475_v42 = vpop.permute.xlu1 %474 }
 0x15b   : > { %v471_v44 = vpop.permute.xlu0 %470  ;;  %v484_v50 = vmul.f32 %v475_v42, %v940_v45 }
 0x15c   : > { %v482_v53 = vmul.f32 %v471_v44, %v942_v47 }
 0x15e   : > { %v477_v48 = vpop.permute.xlu1 %476 }
 0x15f   : > { %v485_v51 = vmul.f32 %v477_v48, %v398_v46  ;;  %v473_v52 = vpop.permute.xlu0 %472 }
 0x160   : > { %v483_v54 = vmul.f32 %v473_v52, %v944_v49 }
 0x161   : > { %v487_v55 = vpack.c.bf16 %v485_v51, %v484_v50 }
 0x162   : > { %v486_v56 = vpack.c.bf16 %v483_v54, %v482_v53 }
 0x163   : > { %496 = vrot.lane.b32.xlu1 %v487_v55, %s860_s22 }
 0x164   : > { %494 = vrot.lane.b32.xlu0 %v486_v56, %s860_s22 }
 0x1d5   : > { %v497_v58 = vpop.permute.xlu1 %496 }
 0x1d6   : > { %v495_v57 = vpop.permute.xlu0 %494 }
 0x1d7   : > { %788 = vmatprep.mubr.msk.bf16.mxu1 %vm315_vm2, %v495_v57 }
 0x1d8   : > { %789 = vmatmul.mubr.msk.bf16.vlgmr.msra.gmra.mrb[4].mxu1 %vm315_vm2, %v497_v58 }
 0x2ab   : > { %v790_v59 = vpop.f32.mrb[4].mxu1 }
 0x2ac   : > { %v736_v60 = vmul.f32 -1.442695, %v790_v59  ;;  %v550_v61 = vpop.f32.mrb[5].mxu1 }
 0x2ad   : > { %v734_v62 = vmul.f32 -1.442695, %v550_v61  ;;  %v791_v63 = vpop.f32.mrb[6].mxu1 }
 0x2ae   : > { %835 = vpow2.f32 %v736_v60  ;;  %v737_v0 = vmul.f32 -1.442695, %v791_v63  ;;  %v553_v1 = vpop.f32.mrb[7].mxu1 }
 0x2af   : > { %837 = vpow2.f32 %v734_v62  ;;  %v735_v2 = vmul.f32 -1.442695, %v553_v1 }
 0x2b0   : > { %839 = vpow2.f32 %v737_v0 }
 0x2b1   : > { %841 = vpow2.f32 %v735_v2 }
 0x2b8   : > { %v836_v3 = vpop.eup %835 }
 0x2b9   : > { %v838_v4 = vpop.eup %837  ;;  %v579_v5 = vadd.f32 1.0, %v836_v3 }
 0x2ba   : > { %v840_v6 = vpop.eup %839  ;;  %v577_v7 = vadd.f32 1.0, %v838_v4 }
 0x2bb   : > { %v842_v8 = vpop.eup %841  ;;  %843 = vrcp.f32 %v579_v5  ;;  %v580_v9 = vadd.f32 1.0, %v840_v6 }
 0x2bc   : > { %845 = vrcp.f32 %v577_v7  ;;  %v578_v10 = vadd.f32 1.0, %v842_v8 }
 0x2bd   : > { %847 = vrcp.f32 %v580_v9 }
 0x2be   : > { %849 = vrcp.f32 %v578_v10 }
 0x2c5   : > { %v844_v11 = vpop.eup %843 }
 0x2c6   : > { %v846_v12 = vpop.eup %845  ;;  %v591_v15 = vmul.f32 %v844_v11, %v790_v59 }
 0x2c7   : > { %v848_v13 = vpop.eup %847  ;;  %v589_v17 = vmul.f32 %v846_v12, %v550_v61 }
 0x2c8   : > { %v850_v14 = vpop.eup %849  ;;  %v592_v16 = vmul.f32 %v848_v13, %v791_v63 }
 0x2c9   : > { %v590_v18 = vmul.f32 %v850_v14, %v553_v1 }
 0x2ca   : > { %v808_v19 = vpack.i.bf16 %v592_v16, %v591_v15 }
 0x2cb   : > { %v803_v20 = vpack.i.bf16 %v590_v18, %v589_v17 }
 0x2cc   : > { %809 = vrot.lane.b32.xlu1 %v808_v19, %s859_s18 }
 0x2cd   : > { %804 = vrot.lane.b32.xlu0 %v803_v20, %s859_s18 }
 0x33e   : > { %v810_v21 = vpop.permute.xlu1 %809 }
 0x33f   : > { %v812_v22 = vunpack.i.h.bf16 %v810_v21  ;;  %v811_v23 = vunpack.i.l.bf16 %v810_v21  ;;  %v805_v24 = vpop.permute.xlu0 %804 }
 0x340   : > { %v807_v25 = vunpack.i.h.bf16 %v805_v24  ;;  %v806_v26 = vunpack.i.l.bf16 %v805_v24 }
 0x341   : > { %v612_v27 = vsel %vm315_vm2, %v398_v46, %v812_v22  ;;  %v611_v28 = vsel %vm315_vm2, %v940_v45, %v811_v23 }
 0x342   : > { %v617_v29 = vsel %vm613_vm3, %v612_v27, 0.0  ;;  %v616_v30 = vsel %vm613_vm3, %v611_v28, 0.0  ;;  %v610_v31 = vsel %vm315_vm2, %v944_v49, %v807_v25  ;;  %v609_v32 = vsel %vm315_vm2, %v942_v47, %v806_v26 }
 0x343   : > { %v615_v33 = vsel %vm613_vm3, %v610_v31, 0.0  ;;  %v614_v34 = vsel %vm613_vm3, %v609_v32, 0.0  ;;  %v756_v36 = vpack.c.bf16 %v617_v29, %v616_v30 }
 0x344   : > { %v751_v35 = vpack.c.bf16 %v615_v33, %v614_v34 }
 0x345   : > { %758 = vst [vmem:[%s275_s26 + $0x8] sm:$0xff] %v756_v36  }
 0x346   : > { %752 = vst [vmem:[%s275_s26] sm:$0xff] %v751_v35  }
 0x347 PF: > { %s16_s21 = sadd.s32 1, %s857_s21  }
 0x348   : > { %p13_p4 = scmp.ge.s32.totalorder %s16_s21, 4  }
 0x34a   :  { %15 = sbr.rel (!%p13_p4) target bundleno = 1 (0x1), region = 77 }

// kernel: _lambda_.10
= control target key start
LH: loop header
LB: loop body
LE: loop exit
PB: predicated region body
PF: predicated region fallthrough
CT: control target
= control target key end

     0   :  { %s1047_s27 = smov 0   ;;  %s1137_s0 = inlined_call_operand.vmem [shape: bf16[64,32], index: 0, kind: input, shape index: {}]   ;;  %s1138_s1 = inlined_call_operand.vmem [shape: bf16[64,32], index: 1, kind: input, shape index: {}]   ;;  %s1139_s2 = inlined_call_operand.vmem [shape: f32[64,6], index: 2, kind: input, shape index: {}]   ;;  %s1140_s3 = inlined_call_operand.vmem [shape: bf16[6,32], index: 3, kind: input, shape index: {}]   ;;  %s1141_s4 = inlined_call_operand.vmem [shape: f32[1,32], index: 4, kind: input, shape index: {}]   ;;  %s1142_s5 = inlined_call_operand.vmem [shape: bf16[96,32], index: 5, kind: input, shape index: {}]   ;;  %s1143_s6 = inlined_call_operand.vmem [shape: f32[1,32], index: 6, kind: input, shape index: {}]   ;;  %s1144_s7 = inlined_call_operand.vmem [shape: bf16[6,32], index: 7, kind: input, shape index: {}]   ;;  %s1145_s8 = inlined_call_operand.vmem [shape: bf16[64,128], index: 8, kind: output, shape index: {}]  }
   0x1 LB: > { %s826_s28 = sadd.s32 4294967295, %s998_s27   ;;  %p830_p0 = scmp.ge.s32.totalorder %s998_s27, 1  ;;  %s998_s27 = sphi %s1047_s27, %s18_s27  }
   0x2   : > { %p285_p1 = scmp.lt.s32.totalorder %s998_s27, 3 }
   0x4   : > { %p286_p2 = pnand %p830_p0, %p285_p1 }
   0x5   : > { %v360_v0 = vld [vmem:[%s1140_s3] sm:$0x7] (!%p286_p2)  ;;  %vm375_vm0 = vcmask (!%p286_p2), 1042432   ;;  %s831_s9 = sshll.u32 (!%p286_p2), %s826_s28, 2  ;;  %vm368_vm1 = vcmask (!%p286_p2), 48128   ;;  %s1000_s21 = smov (!%p286_p2), 32  }
   0x6   : > { %289 = sbr.rel (%p286_p2) target bundleno = 758 (0x2f6), region = 52  ;;  %928 = vmatprep.subr.msk.bf16.mxu0 (!%p286_p2), %vm375_vm0, %v360_v0  ;;  %v377_v1 = vsel (!%p286_p2), %vm375_vm0, %v360_v0, 0  ;;  %p330_p3 = scmp.lt.s32.totalorder (!%p286_p2), %s831_s9, 7  ;;  %v952_v10 = vld [vmem:[%s1142_s5] sm:$0xff] (!%p286_p2)   ;;  %v953_v11 = vld [vmem:[%s1142_s5 + $0x8] sm:$0xff] (!%p286_p2)   ;;  %v954_v12 = vld [vmem:[%s1142_s5 + $0x10] sm:$0xff] (!%p286_p2)  }
   0x7   : > { %901 = vmatpush3.bf16.msra.mxu0 (!%p286_p2), %v377_v1  ;;  %906 = vmatprep.subr.bf16.mxu1 (!%p286_p2), %v952_v10  ;;  %v955_v13 = vld [vmem:[%s1142_s5 + $0x18] sm:$0xff] (!%p286_p2)   ;;  %v956_v14 = vld [vmem:[%s1142_s5 + $0x20] sm:$0xff] (!%p286_p2)   ;;  %v958_v36 = vld [vmem:[%s1142_s5 + $0x28] sm:$0xff] (!%p286_p2)   ;;  %s1001_s18 = smov (!%p286_p2), 64   ;;  %vm496_vm2 = vcmask (!%p286_p2), 261120   ;;  %vm503_vm3 = vcmask (!%p286_p2), 523264  }
   0x8   : > { %907 = vmatpush3.bf16.msra.mxu1 (!%p286_p2), %v952_v10  ;;  %v839_v15 = vld [vmem:[%s1141_s4] ss:$0 sm:$0xff] (!%p286_p2)  ;;  %vm563_vm4 = vcmask (!%p286_p2), 785408  }
   0x9   : > { %908 = vmatprep.subr.bf16.mxu1 (!%p286_p2), %v953_v11  ;;  %v645_v38 = vld [vmem:[%s1144_s7] sm:$0x7] (!%p286_p2) }
   0xa   : > { %929 = vmatprep.subr.msk.bf16.mxu0 (!%p286_p2), %vm375_vm0, %v645_v38  ;;  %v647_v40 = vsel (!%p286_p2), %vm375_vm0, %v645_v38, 0  ;;  %v850_v63 = vld [vmem:[%s1143_s6] ss:$0 sm:$0xff] (!%p286_p2) }
   0xc   : > { %909 = vmatpush3.bf16.msra.mxu1 (!%p286_p2), %v953_v11 }
   0xd   : > { %s1147_s9 = smov (!%p330_p3, %s831_s9), 7  ;;  %910 = vmatprep.subr.bf16.mxu1 %v954_v12 }
   0xe   : > { %s836_s10 = sshll.u32 %s1147_s9, 3  ;;  %s1069_s14 = sshll.u32 %s1147_s9, 2 }
   0xf   : > { %s345_s13 = scalar_lea.vmem %s1139_s2, %s836_s10  ;;  %s339_s17 = scalar_lea.vmem %s1138_s1, %s1069_s14 }
  0x10   : > { %v354_v2 = vld [vmem:[%s345_s13] sm:$0xff]  ;;  %v355_v3 = vld [vmem:[%s345_s13 + $0x8] sm:$0xff]  ;;  %v356_v4 = vld [vmem:[%s345_s13 + $0x10] sm:$0xff]  ;;  %s1079_s20 = scalar_lea.vmem %s1137_s0, %s1069_s14  ;;  %911 = vmatpush3.bf16.msra.mxu1 %v954_v12  ;;  %s351_s23 = scalar_lea.vmem %s1145_s8, %s1069_s14 }
  0x11   : > { %v358_v5 = vpack.c.bf16 %v355_v3, %v354_v2  ;;  %v357_v6 = vld [vmem:[%s345_s13 + $0x18] sm:$0xff]  ;;  %v950_v8 = vld [vmem:[%s339_s17] sm:$0xff]   ;;  %v951_v9 = vld [vmem:[%s339_s17 + $0x8] sm:$0xff]   ;;  %912 = vmatprep.subr.bf16.mxu1 %v955_v13 }
  0x12   : > { %v1063_v7 = vpack.c.bf16 %v357_v6, %v356_v4  ;;  %486 = vrot.lane.b32.xlu0 %v950_v8, %s1000_s21  ;;  %v957_v50 = vld [vmem:[%s1079_s20] sm:$0xff]   ;;  %v959_v52 = vld [vmem:[%s1079_s20 + $0x8] sm:$0xff]  }
  0x13   : > { %902 = vmatprep.mubr.msk.bf16.mxu0 %vm368_vm1, %v358_v5 }
  0x14   : > { %903 = vmatmul.mubr.msk.bf16.vlgmr.msra.gmra.mrb[0].mxu0 %vm368_vm1, %v1063_v7  ;;  %913 = vmatpush3.bf16.msra.mxu1 %v955_v13 }
  0x15   : > { %924 = vmatprep.mubr.msk.bf16.mxu0 %vm368_vm1, %v358_v5  ;;  %914 = vmatprep.subr.bf16.mxu1 %v956_v14 }
  0x16   : > { %488 = vrot.lane.b32.xlu0 %v951_v9, %s1000_s21  ;;  %923 = vmatpush3.bf16.msra.mxu0 %v647_v40 }
  0x18   : > { %915 = vmatpush3.bf16.msra.mxu1 %v956_v14 }
  0x19   : > { %916 = vmatprep.subr.bf16.mxu1 %v958_v36 }
  0x1c   : > { %917 = vmatpush3.bf16.msra.mxu1 %v958_v36  ;;  %925 = vmatmul.mubr.msk.bf16.vlgmr.msra.gmra.mrb[4].mxu0 %vm368_vm1, %v1063_v7 }
  0x84   : > { %v487_v49 = vpop.permute.xlu0 %486 }
  0x85   : > { %v499_v51 = vsel %vm496_vm2, %v957_v50, %v487_v49 }
  0x88   : > { %v489_v53 = vpop.permute.xlu0 %488 }
  0x89   : > { %v502_v56 = vsel %vm496_vm2, %v959_v52, %v489_v53 }
  0xe7   : > { %v904_v16 = vpop.f32.mrb[0].mxu0 }
  0xe8   : > { %v422_v17 = vadd.f32 %v904_v16, %v839_v15  ;;  %v413_v18 = vpop.f32.mrb[1].mxu0 }
  0xe9   : > { %v414_v19 = vadd.f32 %v839_v15, %v413_v18  ;;  %v905_v20 = vpop.f32.mrb[2].mxu0 }
  0xea   : > { %v844_v21 = vmul.f32 -1.442695, %v422_v17  ;;  %v425_v22 = vadd.f32 %v905_v20, %v839_v15  ;;  %v416_v23 = vpop.f32.mrb[3].mxu0 }
  0xeb   : > { %v842_v24 = vmul.f32 -1.442695, %v414_v19  ;;  %v417_v25 = vadd.f32 %v839_v15, %v416_v23 }
  0xec   : > { %960 = vpow2.f32 %v844_v21  ;;  %v845_v26 = vmul.f32 -1.442695, %v425_v22 }
  0xed   : > { %962 = vpow2.f32 %v842_v24  ;;  %v843_v27 = vmul.f32 -1.442695, %v417_v25 }
  0xee   : > { %964 = vpow2.f32 %v845_v26 }
  0xef   : > { %966 = vpow2.f32 %v843_v27  ;;  %v926_v59 = vpop.f32.mrb[4].mxu0 }
  0xf0   : > { %v683_v60 = vpop.f32.mrb[5].mxu0 }
  0xf1   : > { %v927_v61 = vpop.f32.mrb[6].mxu0 }
  0xf2   : > { %v686_v62 = vpop.f32.mrb[7].mxu0 }
  0xf6   : > { %v961_v28 = vpop.eup %960 }
  0xf7   : > { %v963_v29 = vpop.eup %962  ;;  %v442_v30 = vadd.f32 1.0, %v961_v28 }
  0xf8   : > { %v965_v31 = vpop.eup %964  ;;  %v440_v32 = vadd.f32 1.0, %v963_v29 }
  0xf9   : > { %v967_v33 = vpop.eup %966  ;;  %968 = vrcp.f32 %v442_v30  ;;  %v443_v34 = vadd.f32 1.0, %v965_v31 }
  0xfa   : > { %970 = vrcp.f32 %v440_v32  ;;  %v441_v35 = vadd.f32 1.0, %v967_v33 }
  0xfb   : > { %972 = vrcp.f32 %v443_v34 }
  0xfc   : > { %974 = vrcp.f32 %v441_v35 }
 0x103   : > { %v969_v37 = vpop.eup %968 }
 0x104   : > { %v971_v39 = vpop.eup %970  ;;  %v454_v43 = vmul.f32 %v969_v37, %v422_v17 }
 0x105   : > { %v973_v41 = vpop.eup %972  ;;  %v452_v45 = vmul.f32 %v971_v39, %v414_v19 }
 0x106   : > { %v975_v42 = vpop.eup %974  ;;  %v455_v44 = vmul.f32 %v973_v41, %v425_v22 }
 0x107   : > { %v453_v46 = vmul.f32 %v975_v42, %v417_v25 }
 0x108   : > { %v465_v47 = vpack.c.bf16 %v455_v44, %v454_v43 }
 0x109   : > { %v464_v48 = vpack.c.bf16 %v453_v46, %v452_v45 }
 0x10b   : > { %492 = vrot.lane.b32.xlu1 %v464_v48, %s1001_s18 }
 0x10f   : > { %494 = vrot.lane.b32.xlu1 %v465_v47, %s1001_s18 }
 0x17d   : > { %v493_v54 = vpop.permute.xlu1 %492 }
 0x17e   : > { %v505_v55 = vsel %vm503_vm3, %v499_v51, %v493_v54 }
 0x17f   : > { %918 = vmatprep.mubr.msk.bf16.mxu1 %vm563_vm4, %v505_v55 }
 0x181   : > { %v495_v57 = vpop.permute.xlu1 %494 }
 0x182   : > { %v507_v58 = vsel %vm503_vm3, %v502_v56, %v495_v57 }
 0x183   : > { %919 = vmatmul.mubr.msk.bf16.vlgmr.msra.gmra.mrb[0].mxu1 %vm563_vm4, %v507_v58 }
 0x256   : > { %v920_v0 = vpop.f32.mrb[0].mxu1 }
 0x257   : > { %v611_v1 = vadd.f32 %v920_v0, %v850_v63  ;;  %v602_v2 = vpop.f32.mrb[1].mxu1 }
 0x258   : > { %v603_v3 = vadd.f32 %v850_v63, %v602_v2  ;;  %v921_v4 = vpop.f32.mrb[2].mxu1 }
 0x259   : > { %v861_v5 = vmul.f32 -1.442695, %v611_v1  ;;  %v614_v6 = vadd.f32 %v921_v4, %v850_v63  ;;  %v605_v7 = vpop.f32.mrb[3].mxu1 }
 0x25a   : > { %v859_v8 = vmul.f32 -1.442695, %v603_v3  ;;  %v606_v9 = vadd.f32 %v850_v63, %v605_v7 }
 0x25b   : > { %976 = vpow2.f32 %v861_v5  ;;  %v862_v10 = vmul.f32 -1.442695, %v614_v6 }
 0x25c   : > { %978 = vpow2.f32 %v859_v8  ;;  %v860_v11 = vmul.f32 -1.442695, %v606_v9 }
 0x25d   : > { %980 = vpow2.f32 %v862_v10 }
 0x25e   : > { %982 = vpow2.f32 %v860_v11 }
 0x265   : > { %v977_v12 = vpop.eup %976 }
 0x266   : > { %v979_v13 = vpop.eup %978  ;;  %v631_v14 = vadd.f32 1.0, %v977_v12 }
 0x267   : > { %v981_v15 = vpop.eup %980  ;;  %v629_v16 = vadd.f32 1.0, %v979_v13 }
 0x268   : > { %v983_v17 = vpop.eup %982  ;;  %984 = vrcp.f32 %v631_v14  ;;  %v632_v18 = vadd.f32 1.0, %v981_v15 }
 0x269   : > { %986 = vrcp.f32 %v629_v16  ;;  %v630_v19 = vadd.f32 1.0, %v983_v17 }
 0x26a   : > { %988 = vrcp.f32 %v632_v18 }
 0x26b   : > { %990 = vrcp.f32 %v630_v19 }
 0x272   : > { %v985_v20 = vpop.eup %984 }
 0x273   : > { %v987_v21 = vpop.eup %986  ;;  %v643_v22 = vmul.f32 %v985_v20, %v611_v1 }
 0x274   : > { %v989_v23 = vpop.eup %988  ;;  %v641_v24 = vmul.f32 %v987_v21, %v603_v3 }
 0x275   : > { %v991_v25 = vpop.eup %990  ;;  %v644_v26 = vmul.f32 %v989_v23, %v614_v6  ;;  %v700_v28 = vmul.f32 %v926_v59, %v643_v22 }
 0x276   : > { %v642_v27 = vmul.f32 %v991_v25, %v606_v9  ;;  %v698_v30 = vmul.f32 %v683_v60, %v641_v24 }
 0x277   : > { %v701_v29 = vmul.f32 %v927_v61, %v644_v26 }
 0x278   : > { %v699_v31 = vmul.f32 %v686_v62, %v642_v27 }
 0x279   : > { %v945_v32 = vpack.i.bf16 %v701_v29, %v700_v28 }
 0x27a   : > { %v940_v33 = vpack.i.bf16 %v699_v31, %v698_v30 }
 0x27b   : > { %946 = vrot.lane.b32.xlu1 %v945_v32, %s1000_s21 }
 0x27c   : > { %941 = vrot.lane.b32.xlu0 %v940_v33, %s1000_s21 }
 0x2ed   : > { %v947_v34 = vpop.permute.xlu1 %946 }
 0x2ee   : > { %v949_v35 = vunpack.i.h.bf16 %v947_v34  ;;  %v948_v36 = vunpack.i.l.bf16 %v947_v34  ;;  %v942_v37 = vpop.permute.xlu0 %941 }
 0x2ef   : > { %v944_v38 = vunpack.i.h.bf16 %v942_v37  ;;  %v943_v39 = vunpack.i.l.bf16 %v942_v37 }
 0x2f0   : > { %v721_v40 = vsel %vm496_vm2, %v644_v26, %v949_v35  ;;  %v720_v41 = vsel %vm496_vm2, %v643_v22, %v948_v36 }
 0x2f1   : > { %v725_v42 = vsel %vm503_vm3, %v721_v40, 0.0  ;;  %v724_v43 = vsel %vm503_vm3, %v720_v41, 0.0  ;;  %v719_v44 = vsel %vm496_vm2, %v642_v27, %v944_v38  ;;  %v718_v45 = vsel %vm496_vm2, %v641_v24, %v943_v39 }
 0x2f2   : > { %v723_v46 = vsel %vm503_vm3, %v719_v44, 0.0  ;;  %v722_v47 = vsel %vm503_vm3, %v718_v45, 0.0  ;;  %v883_v49 = vpack.c.bf16 %v725_v42, %v724_v43 }
 0x2f3   : > { %v878_v48 = vpack.c.bf16 %v723_v46, %v722_v47 }
 0x2f4   : > { %885 = vst [vmem:[%s351_s23 + $0x8] sm:$0xff] %v883_v49  }
 0x2f5   : > { %879 = vst [vmem:[%s351_s23] sm:$0xff] %v878_v48  }
 0x2f6 PF: > { %s18_s27 = sadd.s32 1, %s998_s27  }
 0x2f7   : > { %p15_p4 = scmp.ge.s32.totalorder %s18_s27, 4  }
 0x2f9   :  { %17 = sbr.rel (!%p15_p4) target bundleno = 1 (0x1), region = 88 }

// kernel: _lambda_.19
= control target key start
LH: loop header
LB: loop body
LE: loop exit
PB: predicated region body
PF: predicated region fallthrough
CT: control target
= control target key end

     0   :  { %v536_v0 = vmov 0.0   ;;  %vm537_vm0 = vmmov 0   ;;  %vm62_vm1 = vcmask 261120   ;;  %s672_s1 = inlined_call_operand.vmem [shape: bf16[32,32], index: 1, kind: input, shape index: {}]   ;;  %s673_s0 = inlined_call_operand.vmem [shape: f32[16,32], index: 0, kind: input, shape index: {}]   ;;  %s674_s3 = inlined_call_operand.vmem [shape: bf16[32,32], index: 3, kind: input, shape index: {}]   ;;  %s675_s2 = inlined_call_operand.vmem [shape: f32[1,32], index: 2, kind: input, shape index: {}]   ;;  %s676_s5 = inlined_call_operand.vmem [shape: bf16[32,32], index: 5, kind: input, shape index: {}]   ;;  %s677_s4 = inlined_call_operand.vmem [shape: f32[1,32], index: 4, kind: input, shape index: {}]   ;;  %s678_s7 = inlined_call_operand.vmem [shape: bf16[32,32], index: 7, kind: input, shape index: {}]   ;;  %s679_s6 = inlined_call_operand.vmem [shape: f32[1,32], index: 6, kind: input, shape index: {}]   ;;  %s680_s9 = inlined_call_operand.vmem [shape: bf16[32,128], index: 9, kind: input, shape index: {}]   ;;  %s681_s8 = inlined_call_operand.vmem [shape: f32[1,32], index: 8, kind: input, shape index: {}]   ;;  %s682_s10 = inlined_call_operand.vmem [shape: f32[16,128], index: 10, kind: output, shape index: {}]  }
   0x1   :  { %460 = vmatprep.subr.bf16.mxu0 %v536_v0  ;;  %v502_v1 = vld [vmem:[%s672_s1] sm:$0xff]   ;;  %464 = vmatprep.mubr.msk.bf16.mxu0 %vm537_vm0, %v536_v0  ;;  %v503_v2 = vld [vmem:[%s672_s1 + $0x8] sm:$0xff]  }
   0x2   :  { %468 = vmatprep.subr.bf16.mxu1 %v536_v0  ;;  %472 = vmatprep.mubr.msk.bf16.mxu1 %vm537_vm0, %v536_v0  ;;  %v36_v3 = vld [vmem:[%s673_s0] sm:$0xff]  ;;  %v37_v4 = vld [vmem:[%s673_s0 + $0x8] sm:$0xff] }
   0x3   :  { %461 = vmatpush3.bf16.msra.mxu0 %v502_v1  ;;  %v38_v5 = vpack.c.bf16 %v37_v4, %v36_v3  ;;  %v504_v6 = vld [vmem:[%s674_s3] sm:$0xff]   ;;  %v505_v7 = vld [vmem:[%s674_s3 + $0x8] sm:$0xff]  }
   0x4   :  { %462 = vmatprep.subr.bf16.mxu0 %v536_v0  ;;  %469 = vmatpush3.bf16.msra.mxu1 %v504_v6  ;;  %v420_v8 = vld [vmem:[%s675_s2] ss:$0 sm:$0xff]  ;;  %v507_v17 = vld [vmem:[%s676_s5 + $0x8] sm:$0xff]  }
   0x5   :  { %470 = vmatprep.subr.bf16.mxu1 %v536_v0  ;;  %v506_v16 = vld [vmem:[%s676_s5] sm:$0xff]   ;;  %v509_v37 = vld [vmem:[%s678_s7 + $0x8] sm:$0xff]  }
   0x6   :  { %v424_v18 = vld [vmem:[%s677_s4] ss:$0 sm:$0xff]  ;;  %v511_v57 = vld [vmem:[%s680_s9 + $0x8] sm:$0xff]  }
   0x7   :  { %463 = vmatpush3.bf16.msra.mxu0 %v503_v2  ;;  %v508_v36 = vld [vmem:[%s678_s7] sm:$0xff]  }
   0x8   :  { %476 = vmatprep.subr.bf16.mxu0 %v536_v0  ;;  %471 = vmatpush3.bf16.msra.mxu1 %v505_v7  ;;  %v430_v38 = vld [vmem:[%s679_s6] ss:$0 sm:$0xff] }
   0x9   :  { %484 = vmatprep.subr.bf16.mxu1 %v536_v0  ;;  %v510_v56 = vld [vmem:[%s680_s9] sm:$0xff]  }
   0xa   :  { %465 = vmatmul.mubr.msk.bf16.vlgmr.msra.gmra.mrb[0].mxu0 %vm62_vm1, %v38_v5  ;;  %v436_v58 = vld [vmem:[%s681_s8] ss:$0 sm:$0xff] }
   0xb   :  { %480 = vmatprep.mubr.msk.bf16.mxu0 %vm537_vm0, %v536_v0  ;;  %477 = vmatpush3.bf16.msra.mxu0 %v506_v16 }
   0xc   :  { %478 = vmatprep.subr.bf16.mxu0 %v536_v0 }
   0xf   :  { %479 = vmatpush3.bf16.msra.mxu0 %v507_v17 }
  0x10   :  { %492 = vmatprep.subr.bf16.mxu0 %v536_v0 }
  0xdd   :  { %v100_v9 = vpop.f32.mrb[0].mxu0 }
  0xde   :  { %v466_v10 = vpop.f32.mrb[1].mxu0  ;;  %v101_v12 = vadd.f32 %v420_v8, %v100_v9 }
  0xdf   :  { %v103_v11 = vpop.f32.mrb[2].mxu0 }
  0xe0   :  { %v104_v13 = vadd.f32 %v420_v8, %v103_v11  ;;  %v467_v14 = vpop.f32.mrb[3].mxu0 }
  0xe2   :  { %v107_v15 = vpack.c.bf16 %v104_v13, %v101_v12 }
  0xe4   :  { %473 = vmatmul.mubr.msk.bf16.vlgmr.msra.gmra.mrb[0].mxu1 %vm62_vm1, %v107_v15 }
  0xe5   :  { %488 = vmatprep.mubr.msk.bf16.mxu1 %vm537_vm0, %v536_v0  ;;  %485 = vmatpush3.bf16.msra.mxu1 %v508_v36 }
  0xe6   :  { %486 = vmatprep.subr.bf16.mxu1 %v536_v0 }
  0xe9   :  { %487 = vmatpush3.bf16.msra.mxu1 %v509_v37 }
 0x1b7   :  { %v168_v19 = vpop.f32.mrb[0].mxu1 }
 0x1b8   :  { %v169_v20 = vadd.f32 %v424_v18, %v168_v19  ;;  %v474_v21 = vpop.f32.mrb[1].mxu1 }
 0x1b9   :  { %v171_v22 = vpop.f32.mrb[2].mxu1 }
 0x1ba   :  { %v428_v23 = vmul.f32 -1.442695, %v169_v20  ;;  %v172_v24 = vadd.f32 %v424_v18, %v171_v22  ;;  %v475_v25 = vpop.f32.mrb[3].mxu1 }
 0x1bc   :  { %512 = vpow2.f32 %v428_v23  ;;  %v429_v26 = vmul.f32 -1.442695, %v172_v24 }
 0x1be   :  { %514 = vpow2.f32 %v429_v26 }
 0x1c6   :  { %v513_v27 = vpop.eup %512 }
 0x1c7   :  { %v181_v28 = vadd.f32 1.0, %v513_v27 }
 0x1c8   :  { %v515_v29 = vpop.eup %514 }
 0x1c9   :  { %516 = vrcp.f32 %v181_v28  ;;  %v182_v30 = vadd.f32 1.0, %v515_v29 }
 0x1cb   :  { %518 = vrcp.f32 %v182_v30 }
 0x1d3   :  { %v517_v31 = vpop.eup %516 }
 0x1d4   :  { %v187_v33 = vmul.f32 %v517_v31, %v169_v20 }
 0x1d5   :  { %v519_v32 = vpop.eup %518 }
 0x1d6   :  { %v188_v34 = vmul.f32 %v519_v32, %v172_v24 }
 0x1d8   :  { %v189_v35 = vpack.c.bf16 %v188_v34, %v187_v33 }
 0x1da   :  { %481 = vmatmul.mubr.msk.bf16.vlgmr.msra.gmra.mrb[4].mxu0 %vm62_vm1, %v189_v35 }
 0x1db   :  { %496 = vmatprep.mubr.msk.bf16.mxu0 %vm537_vm0, %v536_v0  ;;  %493 = vmatpush3.bf16.msra.mxu0 %v510_v56 }
 0x1dc   :  { %494 = vmatprep.subr.bf16.mxu0 %v536_v0 }
 0x1df   :  { %495 = vmatpush3.bf16.msra.mxu0 %v511_v57 }
 0x2ad   :  { %v250_v39 = vpop.f32.mrb[4].mxu0 }
 0x2ae   :  { %v251_v40 = vadd.f32 %v430_v38, %v250_v39  ;;  %v482_v41 = vpop.f32.mrb[5].mxu0 }
 0x2af   :  { %v253_v42 = vpop.f32.mrb[6].mxu0 }
 0x2b0   :  { %v434_v43 = vmul.f32 -1.442695, %v251_v40  ;;  %v254_v44 = vadd.f32 %v430_v38, %v253_v42  ;;  %v483_v45 = vpop.f32.mrb[7].mxu0 }
 0x2b2   :  { %520 = vpow2.f32 %v434_v43  ;;  %v435_v46 = vmul.f32 -1.442695, %v254_v44 }
 0x2b4   :  { %522 = vpow2.f32 %v435_v46 }
 0x2bc   :  { %v521_v47 = vpop.eup %520 }
 0x2bd   :  { %v263_v48 = vadd.f32 1.0, %v521_v47 }
 0x2be   :  { %v523_v49 = vpop.eup %522 }
 0x2bf   :  { %524 = vrcp.f32 %v263_v48  ;;  %v264_v50 = vadd.f32 1.0, %v523_v49 }
 0x2c1   :  { %526 = vrcp.f32 %v264_v50 }
 0x2c9   :  { %v525_v51 = vpop.eup %524 }
 0x2ca   :  { %v269_v53 = vmul.f32 %v525_v51, %v251_v40 }
 0x2cb   :  { %v527_v52 = vpop.eup %526 }
 0x2cc   :  { %v270_v54 = vmul.f32 %v527_v52, %v254_v44 }
 0x2ce   :  { %v271_v55 = vpack.c.bf16 %v270_v54, %v269_v53 }
 0x2d0   :  { %489 = vmatmul.mubr.msk.bf16.vlgmr.msra.gmra.mrb[4].mxu1 %vm62_vm1, %v271_v55 }
 0x3a3   :  { %v332_v59 = vpop.f32.mrb[4].mxu1 }
 0x3a4   :  { %v333_v60 = vadd.f32 %v436_v58, %v332_v59  ;;  %v490_v61 = vpop.f32.mrb[5].mxu1 }
 0x3a5   :  { %v335_v62 = vpop.f32.mrb[6].mxu1 }
 0x3a6   :  { %v440_v63 = vmul.f32 -1.442695, %v333_v60  ;;  %v336_v1 = vadd.f32 %v436_v58, %v335_v62  ;;  %v491_v2 = vpop.f32.mrb[7].mxu1 }
 0x3a8   :  { %528 = vpow2.f32 %v440_v63  ;;  %v441_v3 = vmul.f32 -1.442695, %v336_v1 }
 0x3aa   :  { %530 = vpow2.f32 %v441_v3 }
 0x3b2   :  { %v529_v0 = vpop.eup %528 }
 0x3b3   :  { %v345_v4 = vadd.f32 1.0, %v529_v0 }
 0x3b4   :  { %v531_v5 = vpop.eup %530 }
 0x3b5   :  { %532 = vrcp.f32 %v345_v4  ;;  %v346_v6 = vadd.f32 1.0, %v531_v5 }
 0x3b7   :  { %534 = vrcp.f32 %v346_v6 }
 0x3bf   :  { %v533_v7 = vpop.eup %532 }
 0x3c0   :  { %v351_v9 = vmul.f32 %v533_v7, %v333_v60 }
 0x3c1   :  { %v535_v8 = vpop.eup %534 }
 0x3c2   :  { %v352_v10 = vmul.f32 %v535_v8, %v336_v1 }
 0x3c4   :  { %v353_v11 = vpack.c.bf16 %v352_v10, %v351_v9 }
 0x3c6   :  { %497 = vmatmul.mubr.msk.bf16.vlgmr.msra.gmra.mrb[8].mxu0 %vm62_vm1, %v353_v11 }
 0x499   :  { %v407_v12 = vpop.f32.mrb[8].mxu0 }
 0x49a   :  { %414 = vst [vmem:[%s682_s10] sm:$0xff] %v407_v12  ;;  %v498_v13 = vpop.f32.mrb[9].mxu0 }
 0x49b   :  { %v410_v14 = vpop.f32.mrb[10].mxu0 }
 0x49c   :  { %415 = vst [vmem:[%s682_s10 + $0x8] sm:$0xff] %v410_v14  ;;  %v499_v15 = vpop.f32.mrb[11].mxu0 }

// kernel: _lambda_.14
= control target key start
LH: loop header
LB: loop body
LE: loop exit
PB: predicated region body
PF: predicated region fallthrough
CT: control target
= control target key end

     0   :  { %s2482_s0 = inlined_call_operand.vmem [shape: bf16[64,128], index: 0, kind: input, shape index: {}]   ;;  %s2483_s1 = inlined_call_operand.vmem [shape: f32[64,16], index: 1, kind: input, shape index: {}]   ;;  %s2484_s2 = inlined_call_operand.vmem [shape: bf16[64,128], index: 2, kind: input, shape index: {}]   ;;  %s2485_s3 = inlined_call_operand.vmem [shape: f32[64,6], index: 3, kind: input, shape index: {}]   ;;  %s2486_s4 = inlined_call_operand.vmem [shape: bf16[16,32], index: 4, kind: input, shape index: {}]   ;;  %s2487_s5 = inlined_call_operand.vmem [shape: bf16[32,32], index: 5, kind: input, shape index: {}]   ;;  %s2488_s6 = inlined_call_operand.vmem [shape: f32[1,32], index: 6, kind: input, shape index: {}]   ;;  %s2489_s7 = inlined_call_operand.vmem [shape: bf16[32,32], index: 7, kind: input, shape index: {}]   ;;  %s2490_s8 = inlined_call_operand.vmem [shape: f32[1,32], index: 8, kind: input, shape index: {}]   ;;  %s2491_s9 = inlined_call_operand.vmem [shape: bf16[32,32], index: 9, kind: input, shape index: {}]   ;;  %s2492_s10 = inlined_call_operand.vmem [shape: f32[1,32], index: 10, kind: input, shape index: {}]   ;;  %s2493_s11 = inlined_call_operand.vmem [shape: bf16[32,32], index: 11, kind: input, shape index: {}]   ;;  %s2494_s12 = inlined_call_operand.vmem [shape: f32[1,32], index: 12, kind: input, shape index: {}]   ;;  %s2495_s13 = inlined_call_operand.vmem [shape: bf16[32,32], index: 13, kind: input, shape index: {}]   ;;  %s2496_s14 = inlined_call_operand.vmem [shape: f32[1,32], index: 14, kind: input, shape index: {}]   ;;  %s2497_s15 = inlined_call_operand.vmem [shape: bf16[32,32], index: 15, kind: input, shape index: {}]   ;;  %s2498_s16 = inlined_call_operand.vmem [shape: f32[1,32], index: 16, kind: input, shape index: {}]   ;;  %s2499_s17 = inlined_call_operand.vmem [shape: bf16[32,32], index: 17, kind: input, shape index: {}]   ;;  %s2500_s18 = inlined_call_operand.vmem [shape: f32[1,32], index: 18, kind: input, shape index: {}]   ;;  %s2501_s19 = inlined_call_operand.vmem [shape: bf16[6,32], index: 19, kind: input, shape index: {}]   ;;  %s2502_s20 = inlined_call_operand.vmem [shape: bf16[64,128], index: 20, kind: output, shape index: {}]  }
   0x1   :  { %2503 = sst [smem:[#allocation2_spill]] %s2482_s0 }
   0x2   :  { %2504 = sst [smem:[#allocation3_spill]] %s2483_s1  ;;  %s2304_s1 = smov 0  }
   0x3   :  { %2505 = sst [smem:[#allocation4_spill]] %s2484_s2 }
   0x4   :  { %2506 = sst [smem:[#allocation5_spill]] %s2485_s3 }
   0x5   :  { %2507 = sst [smem:[#allocation6_spill]] %s2486_s4 }
   0x6 LB: > { %s1799_s22 = sadd.s32 4294967295, %s2196_s1   ;;  %p1803_p0 = scmp.ge.s32.totalorder %s2196_s1, 1  ;;  %s2196_s1 = sphi %s2304_s1, %s30_s1  }
   0x7   : > { %p596_p1 = scmp.lt.s32.totalorder %s2196_s1, 3 }
   0x9   : > { %p597_p2 = pnand %p1803_p0, %p596_p1 }
   0xa   : > { %s2508_s2 = sld [smem:[#allocation6_spill]] (!%p597_p2)  ;;  %s1804_s25 = sshll.u32 (!%p597_p2), %s1799_s22, 2  ;;  %vm722_vm0 = vcmask (!%p597_p2), 130048   ;;  %v2048_v7 = vld [vmem:[%s2487_s5] sm:$0xff] (!%p597_p2)   ;;  %v2049_v8 = vld [vmem:[%s2487_s5 + $0x8] sm:$0xff] (!%p597_p2)   ;;  %vm835_vm1 = vcmask (!%p597_p2), 261120  }
   0xb   : > { %600 = sbr.rel (%p597_p2) target bundleno = 2144 (0x860), region = 100  ;;  %p670_p3 = scmp.lt.s32.totalorder (!%p597_p2), %s1804_s25, 7  ;;  %1965 = vmatprep.subr.bf16.mxu1 (!%p597_p2), %v2048_v7  ;;  %v2050_v45 = vld [vmem:[%s2489_s7] sm:$0xff] (!%p597_p2)   ;;  %v2051_v46 = vld [vmem:[%s2489_s7 + $0x8] sm:$0xff] (!%p597_p2)   ;;  %vm1605_vm2 = vcmask (!%p597_p2), 1042432   ;;  %vm1598_vm3 = vcmask (!%p597_p2), 48128  }
   0xc   : > { %s2509_s28 = sld [smem:[#allocation3_spill]] (!%p597_p2)  ;;  %1966 = vmatpush3.bf16.msra.mxu1 (!%p597_p2), %v2048_v7  ;;  %v1821_v47 = vld [vmem:[%s2488_s6] ss:$0 sm:$0xff] (!%p597_p2)  ;;  %s2512_s23 = sld [smem:[#allocation5_spill]] (!%p597_p2)  ;;  %vm1682_vm4 = vcmask (!%p597_p2), 523264  }
   0xd   : > { %1967 = vmatprep.subr.bf16.mxu1 (!%p597_p2), %v2049_v8 }
  0x10   : > { %v2047_v0 = vld [vmem:[%s2508_s2] sm:$0xff] (!%p597_p2)   ;;  %1968 = vmatpush3.bf16.msra.mxu1 (!%p597_p2), %v2049_v8  ;;  %s2510_s2 = sld [smem:[#allocation2_spill]] (!%p597_p2) }
  0x11   : > { %1959 = vmatprep.subr.bf16.mxu0 (!%p597_p2), %v2047_v0 }
  0x12   : > { %1960 = vmatpush3.bf16.msra.mxu0 %v2047_v0  ;;  %s2514_s25 = smov (!%p670_p3, %s1804_s25), 7 }
  0x13   : > { %s1807_s3 = sshll.u32 %s2514_s25, 3  ;;  %s2330_s22 = sshll.u32 %s2514_s25, 2  ;;  %1973 = vmatprep.subr.bf16.mxu0 %v2050_v45 }
  0x14   : > { %s679_s4 = scalar_lea.vmem %s2509_s28, %s1807_s3  ;;  %s691_s24 = scalar_lea.vmem %s2512_s23, %s1807_s3 }
  0x15   : > { %v708_v1 = vld [vmem:[%s679_s4] sm:$0xff]  ;;  %v709_v2 = vld [vmem:[%s679_s4 + $0x8] sm:$0xff]  ;;  %v710_v4 = vld [vmem:[%s679_s4 + $0x10] sm:$0xff]  ;;  %s697_s0 = scalar_lea.vmem %s2502_s20, %s2330_s22 }
  0x16   : > { %v712_v3 = vpack.c.bf16 %v709_v2, %v708_v1  ;;  %v711_v5 = vld [vmem:[%s679_s4 + $0x18] sm:$0xff]  ;;  %s673_s26 = scalar_lea.vmem %s2510_s2, %s2330_s22  ;;  %s2511_s2 = sld [smem:[#allocation4_spill]] }
  0x17   : > { %v713_v6 = vpack.c.bf16 %v711_v5, %v710_v4  ;;  %v1897_v25 = vld [vmem:[%s673_s26] sm:$0xff]   ;;  %v1922_v27 = vld [vmem:[%s673_s26 + $0x8] sm:$0xff]   ;;  %s2198_s4 = smov 32  }
  0x18   : > { %1961 = vmatprep.mubr.msk.bf16.mxu0 %vm722_vm0, %v712_v3  ;;  %v1903_v29 = vunpack.c.h.bf16 %v1922_v27  ;;  %v1898_v32 = vunpack.c.l.bf16 %v1897_v25  ;;  %v1899_v33 = vunpack.c.h.bf16 %v1897_v25  ;;  %v1902_v35 = vunpack.c.l.bf16 %v1922_v27 }
  0x19   : > { %1962 = vmatmul.mubr.msk.bf16.vlgmr.msra.gmra.mrb[0].mxu0 %vm722_vm0, %v713_v6 }
  0x1a   : > { %1974 = vmatpush3.bf16.msra.mxu0 %v2050_v45 }
  0x1b   : > { %1975 = vmatprep.subr.bf16.mxu0 %v2051_v46 }
  0x1c   : > { %s685_s26 = scalar_lea.vmem %s2511_s2, %s2330_s22 }
  0x1e   : > { %1976 = vmatpush3.bf16.msra.mxu0 %v2051_v46 }
  0xec   : > { %v1963_v9 = vpop.f32.mrb[0].mxu0 }
  0xed   : > { %v1819_v10 = vmul.f32 -1.442695, %v1963_v9  ;;  %v763_v11 = vpop.f32.mrb[1].mxu0 }
  0xee   : > { %v1817_v12 = vmul.f32 -1.442695, %v763_v11  ;;  %v1964_v13 = vpop.f32.mrb[2].mxu0 }
  0xef   : > { %2062 = vpow2.f32 %v1819_v10  ;;  %v1820_v14 = vmul.f32 -1.442695, %v1964_v13  ;;  %v766_v15 = vpop.f32.mrb[3].mxu0 }
  0xf0   : > { %2064 = vpow2.f32 %v1817_v12  ;;  %v1818_v16 = vmul.f32 -1.442695, %v766_v15 }
  0xf1   : > { %2066 = vpow2.f32 %v1820_v14  ;;  %v2052_v14 = vld [vmem:[%s2491_s9] sm:$0xff]  }
  0xf2   : > { %2068 = vpow2.f32 %v1818_v16  ;;  %1981 = vmatprep.subr.bf16.mxu1 %v2052_v14  ;;  %v1830_v16 = vld [vmem:[%s2490_s8] ss:$0 sm:$0xff] }
  0xf9   : > { %v2063_v17 = vpop.eup %2062 }
  0xfa   : > { %v2065_v18 = vpop.eup %2064  ;;  %v792_v19 = vadd.f32 1.0, %v2063_v17 }
  0xfb   : > { %v2067_v20 = vpop.eup %2066  ;;  %v790_v21 = vadd.f32 1.0, %v2065_v18 }
  0xfc   : > { %v2069_v22 = vpop.eup %2068  ;;  %2070 = vrcp.f32 %v792_v19  ;;  %v793_v23 = vadd.f32 1.0, %v2067_v20 }
  0xfd   : > { %2072 = vrcp.f32 %v790_v21  ;;  %v791_v24 = vadd.f32 1.0, %v2069_v22 }
  0xfe   : > { %2074 = vrcp.f32 %v793_v23 }
  0xff   : > { %2076 = vrcp.f32 %v791_v24 }
 0x106   : > { %v2071_v26 = vpop.eup %2070 }
 0x107   : > { %v2073_v28 = vpop.eup %2072  ;;  %v804_v36 = vmul.f32 %v2071_v26, %v1963_v9 }
 0x108   : > { %v2075_v30 = vpop.eup %2074  ;;  %v802_v31 = vmul.f32 %v2073_v28, %v763_v11 }
 0x109   : > { %v2077_v34 = vpop.eup %2076  ;;  %v805_v37 = vmul.f32 %v2075_v30, %v1964_v13  ;;  %v2342_v42 = vadd.f32 %v1902_v35, %v804_v36 }
 0x10a   : > { %v803_v38 = vmul.f32 %v2077_v34, %v766_v15  ;;  %v2338_v40 = vadd.f32 %v1898_v32, %v802_v31  ;;  %v2053_v15 = vld [vmem:[%s2491_s9 + $0x8] sm:$0xff]  }
 0x10b   : > { %v2336_v39 = vadd.f32 %v1903_v29, %v805_v37 }
 0x10c   : > { %v2340_v41 = vadd.f32 %v1899_v33, %v803_v38 }
 0x10d   : > { %v811_v44 = vpack.c.bf16 %v2336_v39, %v2342_v42 }
 0x10e   : > { %v810_v43 = vpack.c.bf16 %v2340_v41, %v2338_v40 }
 0x110   : > { %1969 = vmatprep.mubr.msk.bf16.mxu1 %vm835_vm1, %v810_v43 }
 0x111   : > { %1970 = vmatmul.mubr.msk.bf16.vlgmr.msra.gmra.mrb[0].mxu1 %vm835_vm1, %v811_v44 }
 0x112   : > { %1982 = vmatpush3.bf16.msra.mxu1 %v2052_v14 }
 0x113   : > { %1983 = vmatprep.subr.bf16.mxu1 %v2053_v15 }
 0x116   : > { %1984 = vmatpush3.bf16.msra.mxu1 %v2053_v15 }
 0x1e4   : > { %v1971_v48 = vpop.f32.mrb[0].mxu1 }
 0x1e5   : > { %v885_v49 = vadd.f32 %v1971_v48, %v1821_v47  ;;  %v876_v50 = vpop.f32.mrb[1].mxu1 }
 0x1e6   : > { %v877_v51 = vadd.f32 %v1821_v47, %v876_v50  ;;  %v1972_v52 = vpop.f32.mrb[2].mxu1 }
 0x1e7   : > { %v1828_v53 = vmul.f32 -1.442695, %v885_v49  ;;  %v888_v54 = vadd.f32 %v1972_v52, %v1821_v47  ;;  %v879_v55 = vpop.f32.mrb[3].mxu1 }
 0x1e8   : > { %v1826_v56 = vmul.f32 -1.442695, %v877_v51  ;;  %v880_v57 = vadd.f32 %v1821_v47, %v879_v55  ;;  %v2054_v55 = vld [vmem:[%s2493_s11] sm:$0xff]  }
 0x1e9   : > { %2078 = vpow2.f32 %v1828_v53  ;;  %v1829_v58 = vmul.f32 -1.442695, %v888_v54  ;;  %1989 = vmatprep.subr.bf16.mxu0 %v2054_v55 }
 0x1ea   : > { %2080 = vpow2.f32 %v1826_v56  ;;  %v1827_v59 = vmul.f32 -1.442695, %v880_v57 }
 0x1eb   : > { %2082 = vpow2.f32 %v1829_v58 }
 0x1ec   : > { %2084 = vpow2.f32 %v1827_v59 }
 0x1f3   : > { %v2079_v60 = vpop.eup %2078 }
 0x1f4   : > { %v2081_v61 = vpop.eup %2080  ;;  %v905_v62 = vadd.f32 1.0, %v2079_v60 }
 0x1f5   : > { %v2083_v63 = vpop.eup %2082  ;;  %v903_v0 = vadd.f32 1.0, %v2081_v61 }
 0x1f6   : > { %v2085_v1 = vpop.eup %2084  ;;  %2086 = vrcp.f32 %v905_v62  ;;  %v906_v2 = vadd.f32 1.0, %v2083_v63 }
 0x1f7   : > { %2088 = vrcp.f32 %v903_v0  ;;  %v904_v3 = vadd.f32 1.0, %v2085_v1 }
 0x1f8   : > { %2090 = vrcp.f32 %v906_v2 }
 0x1f9   : > { %2092 = vrcp.f32 %v904_v3 }
 0x200   : > { %v2087_v4 = vpop.eup %2086 }
 0x201   : > { %v2089_v5 = vpop.eup %2088  ;;  %v917_v8 = vmul.f32 %v2087_v4, %v885_v49 }
 0x202   : > { %v2091_v6 = vpop.eup %2090  ;;  %v915_v10 = vmul.f32 %v2089_v5, %v877_v51 }
 0x203   : > { %v2093_v7 = vpop.eup %2092  ;;  %v918_v9 = vmul.f32 %v2091_v6, %v888_v54 }
 0x204   : > { %v916_v11 = vmul.f32 %v2093_v7, %v880_v57 }
 0x205   : > { %v920_v12 = vpack.c.bf16 %v918_v9, %v917_v8 }
 0x206   : > { %v919_v13 = vpack.c.bf16 %v916_v11, %v915_v10  ;;  %v1905_v10 = vld [vmem:[%s685_s26] sm:$0xff]  }
 0x208   : > { %1977 = vmatprep.mubr.msk.bf16.mxu0 %vm835_vm1, %v919_v13 }
 0x209   : > { %1978 = vmatmul.mubr.msk.bf16.vlgmr.msra.gmra.mrb[4].mxu0 %vm835_vm1, %v920_v12  ;;  %v1923_v12 = vld [vmem:[%s685_s26 + $0x8] sm:$0xff]  }
 0x20a   : > { %1990 = vmatpush3.bf16.msra.mxu0 %v2054_v55  ;;  %v1911_v14 = vunpack.c.h.bf16 %v1923_v12 }
 0x2dc   : > { %v1979_v17 = vpop.f32.mrb[4].mxu0 }
 0x2dd   : > { %v993_v18 = vadd.f32 %v1979_v17, %v1830_v16  ;;  %v984_v19 = vpop.f32.mrb[5].mxu0  ;;  %v1906_v17 = vunpack.c.l.bf16 %v1905_v10 }
 0x2de   : > { %v985_v20 = vadd.f32 %v1830_v16, %v984_v19  ;;  %v1980_v21 = vpop.f32.mrb[6].mxu0 }
 0x2df   : > { %v1837_v22 = vmul.f32 -1.442695, %v993_v18  ;;  %v996_v23 = vadd.f32 %v1980_v21, %v1830_v16  ;;  %v987_v24 = vpop.f32.mrb[7].mxu0  ;;  %v1910_v21 = vunpack.c.l.bf16 %v1923_v12 }
 0x2e0   : > { %v1835_v25 = vmul.f32 -1.442695, %v985_v20  ;;  %v988_v26 = vadd.f32 %v1830_v16, %v987_v24 }
 0x2e1   : > { %2094 = vpow2.f32 %v1837_v22  ;;  %v1838_v27 = vmul.f32 -1.442695, %v996_v23 }
 0x2e2   : > { %2096 = vpow2.f32 %v1835_v25  ;;  %v1836_v28 = vmul.f32 -1.442695, %v988_v26 }
 0x2e3   : > { %2098 = vpow2.f32 %v1838_v27 }
 0x2e4   : > { %2100 = vpow2.f32 %v1836_v28 }
 0x2eb   : > { %v2095_v29 = vpop.eup %2094 }
 0x2ec   : > { %v2097_v30 = vpop.eup %2096  ;;  %v1013_v31 = vadd.f32 1.0, %v2095_v29 }
 0x2ed   : > { %v2099_v32 = vpop.eup %2098  ;;  %v1011_v33 = vadd.f32 1.0, %v2097_v30  ;;  %v2056_v30 = vld [vmem:[%s2495_s13] sm:$0xff]  }
 0x2ee   : > { %v2101_v34 = vpop.eup %2100  ;;  %2102 = vrcp.f32 %v1013_v31  ;;  %v1014_v35 = vadd.f32 1.0, %v2099_v32  ;;  %1997 = vmatprep.subr.bf16.mxu1 %v2056_v30  ;;  %v2057_v31 = vld [vmem:[%s2495_s13 + $0x8] sm:$0xff]   ;;  %v1848_v32 = vld [vmem:[%s2494_s12] ss:$0 sm:$0xff] }
 0x2ef   : > { %2104 = vrcp.f32 %v1011_v33  ;;  %v1012_v36 = vadd.f32 1.0, %v2101_v34 }
 0x2f0   : > { %2106 = vrcp.f32 %v1014_v35 }
 0x2f1   : > { %2108 = vrcp.f32 %v1012_v36 }
 0x2f8   : > { %v2103_v37 = vpop.eup %2102 }
 0x2f9   : > { %v2105_v38 = vpop.eup %2104  ;;  %v1025_v43 = vmul.f32 %v2103_v37, %v993_v18  ;;  %v1907_v18 = vunpack.c.h.bf16 %v1905_v10 }
 0x2fa   : > { %v2107_v44 = vpop.eup %2106  ;;  %v1023_v45 = vmul.f32 %v2105_v38, %v985_v20 }
 0x2fb   : > { %v2109_v46 = vpop.eup %2108  ;;  %v1026_v47 = vmul.f32 %v2107_v44, %v996_v23  ;;  %v1029_v49 = vadd.f32 %v1025_v43, %v2342_v42 }
 0x2fc   : > { %v1024_v48 = vmul.f32 %v2109_v46, %v988_v26  ;;  %v1027_v51 = vadd.f32 %v1023_v45, %v2338_v40  ;;  %v1839_v40 = vld [vmem:[%s2492_s10] ss:$0 sm:$0xff] }
 0x2fd   : > { %v1030_v50 = vadd.f32 %v1026_v47, %v2336_v39  ;;  %v2055_v39 = vld [vmem:[%s2493_s11 + $0x8] sm:$0xff]  }
 0x2fe   : > { %v1028_v52 = vadd.f32 %v1024_v48, %v2340_v41  ;;  %1991 = vmatprep.subr.bf16.mxu0 %v2055_v39 }
 0x2ff   : > { %v1032_v53 = vpack.c.bf16 %v1030_v50, %v1029_v49  ;;  %1992 = vmatpush3.bf16.msra.mxu0 %v2055_v39 }
 0x300   : > { %v1031_v54 = vpack.c.bf16 %v1028_v52, %v1027_v51 }
 0x302   : > { %1985 = vmatprep.mubr.msk.bf16.mxu1 %vm835_vm1, %v1031_v54 }
 0x303   : > { %1986 = vmatmul.mubr.msk.bf16.vlgmr.msra.gmra.mrb[4].mxu1 %vm835_vm1, %v1032_v53 }
 0x304   : > { %1998 = vmatpush3.bf16.msra.mxu1 %v2056_v30 }
 0x305   : > { %1999 = vmatprep.subr.bf16.mxu1 %v2057_v31 }
 0x308   : > { %2000 = vmatpush3.bf16.msra.mxu1 %v2057_v31 }
 0x3d6   : > { %v1987_v41 = vpop.f32.mrb[4].mxu1 }
 0x3d7   : > { %v1105_v42 = vadd.f32 %v1987_v41, %v1839_v40  ;;  %v1096_v56 = vpop.f32.mrb[5].mxu1 }
 0x3d8   : > { %v1097_v57 = vadd.f32 %v1839_v40, %v1096_v56  ;;  %v1988_v58 = vpop.f32.mrb[6].mxu1 }
 0x3d9   : > { %v1846_v59 = vmul.f32 -1.442695, %v1105_v42  ;;  %v1108_v60 = vadd.f32 %v1988_v58, %v1839_v40  ;;  %v1099_v61 = vpop.f32.mrb[7].mxu1 }
 0x3da   : > { %v1844_v62 = vmul.f32 -1.442695, %v1097_v57  ;;  %v1100_v63 = vadd.f32 %v1839_v40, %v1099_v61 }
 0x3db   : > { %2110 = vpow2.f32 %v1846_v59  ;;  %v1847_v0 = vmul.f32 -1.442695, %v1108_v60 }
 0x3dc   : > { %2112 = vpow2.f32 %v1844_v62  ;;  %v1845_v1 = vmul.f32 -1.442695, %v1100_v63 }
 0x3dd   : > { %2114 = vpow2.f32 %v1847_v0  ;;  %v2059_v0 = vld [vmem:[%s2497_s15 + $0x8] sm:$0xff]  }
 0x3de   : > { %2116 = vpow2.f32 %v1845_v1  ;;  %v1857_v1 = vld [vmem:[%s2496_s14] ss:$0 sm:$0xff] }
 0x3e5   : > { %v2111_v2 = vpop.eup %2110 }
 0x3e6   : > { %v2113_v3 = vpop.eup %2112  ;;  %v1125_v4 = vadd.f32 1.0, %v2111_v2 }
 0x3e7   : > { %v2115_v5 = vpop.eup %2114  ;;  %v1123_v6 = vadd.f32 1.0, %v2113_v3 }
 0x3e8   : > { %v2117_v7 = vpop.eup %2116  ;;  %2118 = vrcp.f32 %v1125_v4  ;;  %v1126_v8 = vadd.f32 1.0, %v2115_v5 }
 0x3e9   : > { %2120 = vrcp.f32 %v1123_v6  ;;  %v1124_v9 = vadd.f32 1.0, %v2117_v7 }
 0x3ea   : > { %2122 = vrcp.f32 %v1126_v8 }
 0x3eb   : > { %2124 = vrcp.f32 %v1124_v9 }
 0x3f2   : > { %v2119_v11 = vpop.eup %2118 }
 0x3f3   : > { %v2121_v13 = vpop.eup %2120  ;;  %v1137_v20 = vmul.f32 %v2119_v11, %v1105_v42 }
 0x3f4   : > { %v2123_v15 = vpop.eup %2122  ;;  %v1135_v16 = vmul.f32 %v2121_v13, %v1097_v57 }
 0x3f5   : > { %v2125_v19 = vpop.eup %2124  ;;  %v1138_v22 = vmul.f32 %v2123_v15, %v1108_v60  ;;  %v2395_v27 = vadd.f32 %v1910_v21, %v1137_v20 }
 0x3f6   : > { %v1136_v23 = vmul.f32 %v2125_v19, %v1100_v63  ;;  %v2391_v25 = vadd.f32 %v1906_v17, %v1135_v16  ;;  %v2058_v63 = vld [vmem:[%s2497_s15] sm:$0xff]  }
 0x3f7   : > { %v2389_v24 = vadd.f32 %v1911_v14, %v1138_v22  ;;  %2005 = vmatprep.subr.bf16.mxu0 %v2058_v63 }
 0x3f8   : > { %v2393_v26 = vadd.f32 %v1907_v18, %v1136_v23 }
 0x3f9   : > { %v1152_v29 = vpack.c.bf16 %v2389_v24, %v2395_v27 }
 0x3fa   : > { %v1151_v28 = vpack.c.bf16 %v2393_v26, %v2391_v25 }
 0x3fc   : > { %1993 = vmatprep.mubr.msk.bf16.mxu0 %vm835_vm1, %v1151_v28 }
 0x3fd   : > { %1994 = vmatmul.mubr.msk.bf16.vlgmr.msra.gmra.mrb[8].mxu0 %vm835_vm1, %v1152_v29 }
 0x3fe   : > { %2006 = vmatpush3.bf16.msra.mxu0 %v2058_v63 }
 0x3ff   : > { %2007 = vmatprep.subr.bf16.mxu0 %v2059_v0 }
 0x402   : > { %2008 = vmatpush3.bf16.msra.mxu0 %v2059_v0 }
 0x4d0   : > { %v1995_v33 = vpop.f32.mrb[8].mxu0 }
 0x4d1   : > { %v1225_v34 = vadd.f32 %v1995_v33, %v1848_v32  ;;  %v1216_v35 = vpop.f32.mrb[9].mxu0 }
 0x4d2   : > { %v1217_v36 = vadd.f32 %v1848_v32, %v1216_v35  ;;  %v1996_v37 = vpop.f32.mrb[10].mxu0 }
 0x4d3   : > { %v1855_v38 = vmul.f32 -1.442695, %v1225_v34  ;;  %v1228_v43 = vadd.f32 %v1996_v37, %v1848_v32  ;;  %v1219_v44 = vpop.f32.mrb[11].mxu0 }
 0x4d4   : > { %v1853_v45 = vmul.f32 -1.442695, %v1217_v36  ;;  %v1220_v46 = vadd.f32 %v1848_v32, %v1219_v44  ;;  %v1597_v44 = vld [vmem:[%s2501_s19] sm:$0x7] }
 0x4d5   : > { %2126 = vpow2.f32 %v1855_v38  ;;  %v1856_v47 = vmul.f32 -1.442695, %v1228_v43  ;;  %2027 = vmatprep.subr.msk.bf16.mxu0 %vm1605_vm2, %v1597_v44 }
 0x4d6   : > { %2128 = vpow2.f32 %v1853_v45  ;;  %v1854_v48 = vmul.f32 -1.442695, %v1220_v46  ;;  %v1591_v45 = vld [vmem:[%s691_s24] sm:$0xff] }
 0x4d7   : > { %2130 = vpow2.f32 %v1856_v47  ;;  %v1607_v47 = vsel %vm1605_vm2, %v1597_v44, 0 }
 0x4d8   : > { %2132 = vpow2.f32 %v1854_v48 }
 0x4df   : > { %v2127_v49 = vpop.eup %2126 }
 0x4e0   : > { %v2129_v50 = vpop.eup %2128  ;;  %v1245_v51 = vadd.f32 1.0, %v2127_v49 }
 0x4e1   : > { %v2131_v52 = vpop.eup %2130  ;;  %v1243_v53 = vadd.f32 1.0, %v2129_v50  ;;  %v1866_v50 = vld [vmem:[%s2498_s16] ss:$0 sm:$0xff] }
 0x4e2   : > { %v2133_v54 = vpop.eup %2132  ;;  %2134 = vrcp.f32 %v1245_v51  ;;  %v1246_v55 = vadd.f32 1.0, %v2131_v52 }
 0x4e3   : > { %2136 = vrcp.f32 %v1243_v53  ;;  %v1244_v39 = vadd.f32 1.0, %v2133_v54 }
 0x4e4   : > { %2138 = vrcp.f32 %v1246_v55 }
 0x4e5   : > { %2140 = vrcp.f32 %v1244_v39 }
 0x4ec   : > { %v2135_v40 = vpop.eup %2134 }
 0x4ed   : > { %v2137_v41 = vpop.eup %2136  ;;  %v1257_v57 = vmul.f32 %v2135_v40, %v1225_v34 }
 0x4ee   : > { %v2139_v42 = vpop.eup %2138  ;;  %v1255_v59 = vmul.f32 %v2137_v41, %v1217_v36 }
 0x4ef   : > { %v2141_v56 = vpop.eup %2140  ;;  %v1258_v58 = vmul.f32 %v2139_v42, %v1228_v43 }
 0x4f0   : > { %v1256_v60 = vmul.f32 %v2141_v56, %v1220_v46  ;;  %v1592_v46 = vld [vmem:[%s691_s24 + $0x8] sm:$0xff] }
 0x4f1   : > { %v1260_v61 = vpack.c.bf16 %v1258_v58, %v1257_v57  ;;  %v1595_v48 = vpack.c.bf16 %v1592_v46, %v1591_v45 }
 0x4f2   : > { %v1259_v62 = vpack.c.bf16 %v1256_v60, %v1255_v59 }
 0x4f4   : > { %2001 = vmatprep.mubr.msk.bf16.mxu1 %vm835_vm1, %v1259_v62 }
 0x4f5   : > { %2002 = vmatmul.mubr.msk.bf16.vlgmr.msra.gmra.mrb[8].mxu1 %vm835_vm1, %v1260_v61 }
 0x5c8   : > { %v2003_v2 = vpop.f32.mrb[8].mxu1 }
 0x5c9   : > { %v1333_v3 = vadd.f32 %v2003_v2, %v1857_v1  ;;  %v1324_v4 = vpop.f32.mrb[9].mxu1 }
 0x5ca   : > { %v1325_v5 = vadd.f32 %v1857_v1, %v1324_v4  ;;  %v2004_v6 = vpop.f32.mrb[10].mxu1 }
 0x5cb   : > { %v1864_v7 = vmul.f32 -1.442695, %v1333_v3  ;;  %v1336_v8 = vadd.f32 %v2004_v6, %v1857_v1  ;;  %v1327_v9 = vpop.f32.mrb[11].mxu1 }
 0x5cc   : > { %v1862_v10 = vmul.f32 -1.442695, %v1325_v5  ;;  %v1328_v11 = vadd.f32 %v1857_v1, %v1327_v9 }
 0x5cd   : > { %2142 = vpow2.f32 %v1864_v7  ;;  %v1865_v12 = vmul.f32 -1.442695, %v1336_v8 }
 0x5ce   : > { %2144 = vpow2.f32 %v1862_v10  ;;  %v1863_v13 = vmul.f32 -1.442695, %v1328_v11 }
 0x5cf   : > { %2146 = vpow2.f32 %v1865_v12 }
 0x5d0   : > { %2148 = vpow2.f32 %v1863_v13 }
 0x5d7   : > { %v2143_v14 = vpop.eup %2142 }
 0x5d8   : > { %v2145_v15 = vpop.eup %2144  ;;  %v1353_v16 = vadd.f32 1.0, %v2143_v14 }
 0x5d9   : > { %v2147_v17 = vpop.eup %2146  ;;  %v1351_v18 = vadd.f32 1.0, %v2145_v15 }
 0x5da   : > { %v2149_v19 = vpop.eup %2148  ;;  %2150 = vrcp.f32 %v1353_v16  ;;  %v1354_v20 = vadd.f32 1.0, %v2147_v17  ;;  %v1875_v17 = vld [vmem:[%s2500_s18] ss:$0 sm:$0xff] }
 0x5db   : > { %2152 = vrcp.f32 %v1351_v18  ;;  %v1352_v21 = vadd.f32 1.0, %v2149_v19 }
 0x5dc   : > { %2154 = vrcp.f32 %v1354_v20 }
 0x5dd   : > { %2156 = vrcp.f32 %v1352_v21 }
 0x5e4   : > { %v2151_v22 = vpop.eup %2150 }
 0x5e5   : > { %v2153_v23 = vpop.eup %2152  ;;  %v1365_v31 = vmul.f32 %v2151_v22, %v1333_v3 }
 0x5e6   : > { %v2155_v28 = vpop.eup %2154  ;;  %v1363_v29 = vmul.f32 %v2153_v23, %v1325_v5 }
 0x5e7   : > { %v2157_v30 = vpop.eup %2156  ;;  %v1366_v32 = vmul.f32 %v2155_v28, %v1336_v8  ;;  %v2433_v37 = vadd.f32 %v1365_v31, %v2395_v27  ;;  %v1594_v27 = vld [vmem:[%s691_s24 + $0x18] sm:$0xff] }
 0x5e8   : > { %v1364_v33 = vmul.f32 %v2157_v30, %v1328_v11  ;;  %v2427_v35 = vadd.f32 %v1363_v29, %v2391_v25  ;;  %v2061_v25 = vld [vmem:[%s2499_s17 + $0x8] sm:$0xff]  }
 0x5e9   : > { %v2424_v34 = vadd.f32 %v1366_v32, %v2389_v24  ;;  %v2060_v24 = vld [vmem:[%s2499_s17] sm:$0xff]  }
 0x5ea   : > { %v2430_v36 = vadd.f32 %v1364_v33, %v2393_v26  ;;  %2013 = vmatprep.subr.bf16.mxu1 %v2060_v24  ;;  %v1593_v26 = vld [vmem:[%s691_s24 + $0x10] sm:$0xff] }
 0x5eb   : > { %v1372_v43 = vpack.c.bf16 %v2424_v34, %v2433_v37  ;;  %2014 = vmatpush3.bf16.msra.mxu1 %v2060_v24  ;;  %v1596_v49 = vpack.c.bf16 %v1594_v27, %v1593_v26 }
 0x5ec   : > { %v1371_v38 = vpack.c.bf16 %v2430_v36, %v2427_v35  ;;  %2015 = vmatprep.subr.bf16.mxu1 %v2061_v25 }
 0x5ee   : > { %2009 = vmatprep.mubr.msk.bf16.mxu0 %vm835_vm1, %v1371_v38 }
 0x5ef   : > { %2010 = vmatmul.mubr.msk.bf16.vlgmr.msra.gmra.mrb[12].mxu0 %vm835_vm1, %v1372_v43  ;;  %2016 = vmatpush3.bf16.msra.mxu1 %v2061_v25 }
 0x5f0   : > { %2022 = vmatpush3.bf16.msra.mxu0 %v1607_v47  ;;  %2023 = vmatprep.mubr.msk.bf16.mxu0 %vm1598_vm3, %v1595_v48 }
 0x5f7   : > { %2024 = vmatmul.mubr.msk.bf16.vlgmr.msra.gmra.mrb[16].mxu0 %vm1598_vm3, %v1596_v49 }
 0x6c2   : > { %v2011_v51 = vpop.f32.mrb[12].mxu0 }
 0x6c3   : > { %v1445_v52 = vadd.f32 %v2011_v51, %v1866_v50  ;;  %v1436_v53 = vpop.f32.mrb[13].mxu0 }
 0x6c4   : > { %v1437_v54 = vadd.f32 %v1866_v50, %v1436_v53  ;;  %v2012_v55 = vpop.f32.mrb[14].mxu0 }
 0x6c5   : > { %v1873_v39 = vmul.f32 -1.442695, %v1445_v52  ;;  %v1448_v40 = vadd.f32 %v2012_v55, %v1866_v50  ;;  %v1439_v41 = vpop.f32.mrb[15].mxu0 }
 0x6c6   : > { %v1871_v42 = vmul.f32 -1.442695, %v1437_v54  ;;  %v1440_v56 = vadd.f32 %v1866_v50, %v1439_v41 }
 0x6c7   : > { %2158 = vpow2.f32 %v1873_v39  ;;  %v1874_v57 = vmul.f32 -1.442695, %v1448_v40 }
 0x6c8   : > { %2160 = vpow2.f32 %v1871_v42  ;;  %v1872_v58 = vmul.f32 -1.442695, %v1440_v56 }
 0x6c9   : > { %2162 = vpow2.f32 %v1874_v57 }
 0x6ca   : > { %2164 = vpow2.f32 %v1872_v58  ;;  %v2025_v13 = vpop.f32.mrb[16].mxu0 }
 0x6cb   : > { %v1643_v14 = vpop.f32.mrb[17].mxu0 }
 0x6cc   : > { %v2026_v15 = vpop.f32.mrb[18].mxu0 }
 0x6cd   : > { %v1646_v16 = vpop.f32.mrb[19].mxu0 }
 0x6d1   : > { %v2159_v59 = vpop.eup %2158 }
 0x6d2   : > { %v2161_v60 = vpop.eup %2160  ;;  %v1465_v61 = vadd.f32 1.0, %v2159_v59 }
 0x6d3   : > { %v2163_v62 = vpop.eup %2162  ;;  %v1463_v63 = vadd.f32 1.0, %v2161_v60 }
 0x6d4   : > { %v2165_v0 = vpop.eup %2164  ;;  %2166 = vrcp.f32 %v1465_v61  ;;  %v1466_v1 = vadd.f32 1.0, %v2163_v62 }
 0x6d5   : > { %2168 = vrcp.f32 %v1463_v63  ;;  %v1464_v2 = vadd.f32 1.0, %v2165_v0 }
 0x6d6   : > { %2170 = vrcp.f32 %v1466_v1 }
 0x6d7   : > { %2172 = vrcp.f32 %v1464_v2 }
 0x6de   : > { %v2167_v3 = vpop.eup %2166 }
 0x6df   : > { %v2169_v4 = vpop.eup %2168  ;;  %v1477_v7 = vmul.f32 %v2167_v3, %v1445_v52 }
 0x6e0   : > { %v2171_v5 = vpop.eup %2170  ;;  %v1475_v9 = vmul.f32 %v2169_v4, %v1437_v54 }
 0x6e1   : > { %v2173_v6 = vpop.eup %2172  ;;  %v1478_v8 = vmul.f32 %v2171_v5, %v1448_v40 }
 0x6e2   : > { %v1476_v10 = vmul.f32 %v2173_v6, %v1440_v56 }
 0x6e3   : > { %v1480_v11 = vpack.c.bf16 %v1478_v8, %v1477_v7 }
 0x6e4   : > { %v1479_v12 = vpack.c.bf16 %v1476_v10, %v1475_v9 }
 0x6e6   : > { %2017 = vmatprep.mubr.msk.bf16.mxu1 %vm835_vm1, %v1479_v12 }
 0x6e7   : > { %2018 = vmatmul.mubr.msk.bf16.vlgmr.msra.gmra.mrb[12].mxu1 %vm835_vm1, %v1480_v11 }
 0x7ba   : > { %v2019_v18 = vpop.f32.mrb[12].mxu1 }
 0x7bb   : > { %v1553_v19 = vadd.f32 %v2019_v18, %v1875_v17  ;;  %v1544_v20 = vpop.f32.mrb[13].mxu1 }
 0x7bc   : > { %v1545_v21 = vadd.f32 %v1875_v17, %v1544_v20  ;;  %v2020_v22 = vpop.f32.mrb[14].mxu1 }
 0x7bd   : > { %v1882_v23 = vmul.f32 -1.442695, %v1553_v19  ;;  %v1556_v28 = vadd.f32 %v2020_v22, %v1875_v17  ;;  %v1547_v29 = vpop.f32.mrb[15].mxu1 }
 0x7be   : > { %v1880_v30 = vmul.f32 -1.442695, %v1545_v21  ;;  %v1548_v31 = vadd.f32 %v1875_v17, %v1547_v29 }
 0x7bf   : > { %2174 = vpow2.f32 %v1882_v23  ;;  %v1883_v32 = vmul.f32 -1.442695, %v1556_v28 }
 0x7c0   : > { %2176 = vpow2.f32 %v1880_v30  ;;  %v1881_v33 = vmul.f32 -1.442695, %v1548_v31 }
 0x7c1   : > { %2178 = vpow2.f32 %v1883_v32 }
 0x7c2   : > { %2180 = vpow2.f32 %v1881_v33 }
 0x7c9   : > { %v2175_v38 = vpop.eup %2174 }
 0x7ca   : > { %v2177_v43 = vpop.eup %2176  ;;  %v1573_v24 = vadd.f32 1.0, %v2175_v38 }
 0x7cb   : > { %v2179_v25 = vpop.eup %2178  ;;  %v1571_v26 = vadd.f32 1.0, %v2177_v43 }
 0x7cc   : > { %v2181_v27 = vpop.eup %2180  ;;  %2182 = vrcp.f32 %v1573_v24  ;;  %v1574_v44 = vadd.f32 1.0, %v2179_v25 }
 0x7cd   : > { %2184 = vrcp.f32 %v1571_v26  ;;  %v1572_v45 = vadd.f32 1.0, %v2181_v27 }
 0x7ce   : > { %2186 = vrcp.f32 %v1574_v44 }
 0x7cf   : > { %2188 = vrcp.f32 %v1572_v45 }
 0x7d6   : > { %v2183_v46 = vpop.eup %2182 }
 0x7d7   : > { %v2185_v47 = vpop.eup %2184  ;;  %v1585_v48 = vmul.f32 %v2183_v46, %v1553_v19 }
 0x7d8   : > { %v2187_v49 = vpop.eup %2186  ;;  %v1583_v50 = vmul.f32 %v2185_v47, %v1545_v21 }
 0x7d9   : > { %v2189_v51 = vpop.eup %2188  ;;  %v1586_v52 = vmul.f32 %v2187_v49, %v1556_v28  ;;  %v1589_v53 = vadd.f32 %v1585_v48, %v2433_v37 }
 0x7da   : > { %v1584_v54 = vmul.f32 %v2189_v51, %v1548_v31  ;;  %v1587_v55 = vadd.f32 %v1583_v50, %v2427_v35 }
 0x7db   : > { %v1590_v39 = vadd.f32 %v1586_v52, %v2424_v34  ;;  %v1660_v41 = vmul.f32 %v2025_v13, %v1589_v53 }
 0x7dc   : > { %v1588_v40 = vadd.f32 %v1584_v54, %v2430_v36  ;;  %v1658_v56 = vmul.f32 %v1643_v14, %v1587_v55 }
 0x7dd   : > { %v1661_v42 = vmul.f32 %v2026_v15, %v1590_v39 }
 0x7de   : > { %v1659_v57 = vmul.f32 %v1646_v16, %v1588_v40 }
 0x7df   : > { %v2042_v58 = vpack.i.bf16 %v1661_v42, %v1660_v41 }
 0x7e0   : > { %v2037_v59 = vpack.i.bf16 %v1659_v57, %v1658_v56 }
 0x7e2   : > { %2038 = vrot.lane.b32.xlu0 %v2037_v59, %s2198_s4 }
 0x7e6   : > { %2043 = vrot.lane.b32.xlu0 %v2042_v58, %s2198_s4 }
 0x854   : > { %v2039_v60 = vpop.permute.xlu0 %2038 }
 0x855   : > { %v2041_v37 = vunpack.i.h.bf16 %v2039_v60  ;;  %v2040_v61 = vunpack.i.l.bf16 %v2039_v60 }
 0x857   : > { %v1679_v35 = vsel %vm835_vm1, %v1588_v40, %v2041_v37  ;;  %v1678_v34 = vsel %vm835_vm1, %v1587_v55, %v2040_v61 }
 0x858   : > { %v1684_v36 = vsel %vm1682_vm4, %v1679_v35, 0.0  ;;  %v1683_v62 = vsel %vm1682_vm4, %v1678_v34, 0.0  ;;  %v2044_v63 = vpop.permute.xlu0 %2043 }
 0x859   : > { %v1915_v0 = vpack.c.bf16 %v1684_v36, %v1683_v62  ;;  %v2046_v1 = vunpack.i.h.bf16 %v2044_v63  ;;  %v2045_v2 = vunpack.i.l.bf16 %v2044_v63 }
 0x85b   : > { %1916 = vst [vmem:[%s697_s0] sm:$0xff] %v1915_v0   ;;  %v1681_v3 = vsel %vm835_vm1, %v1590_v39, %v2046_v1  ;;  %v1680_v4 = vsel %vm835_vm1, %v1589_v53, %v2045_v2 }
 0x85c   : > { %v1686_v5 = vsel %vm1682_vm4, %v1681_v3, 0.0  ;;  %v1685_v6 = vsel %vm1682_vm4, %v1680_v4, 0.0 }
 0x85d   : > { %v1920_v7 = vpack.c.bf16 %v1686_v5, %v1685_v6 }
 0x85f   : > { %1924 = vst [vmem:[%s697_s0 + $0x8] sm:$0xff] %v1920_v7  }
 0x860 PF: > { %s30_s1 = sadd.s32 1, %s2196_s1  }
 0x861   : > { %p27_p4 = scmp.ge.s32.totalorder %s30_s1, 4  }
 0x863   :  { %29 = sbr.rel (!%p27_p4) target bundleno = 6 (0x6), region = 139 }

</bundles_post_ra>
